<compile_context>
chip_gen: v7x
topology: tpu7x:2x2x1
jax: 0.10.0
libtpu: 0.0.40
codegen_flags: <defaults>
</compile_context>

<pallas_src>
import functools

import jax
import jax.numpy as jnp
from jax.experimental import pallas as pl
from jax.experimental.pallas import tpu as pltpu

EPS = 1e-5  # nn.BatchNorm1d default eps


def _bn_train(x, gamma=None, beta=None):
    """BatchNorm1d forward with batch statistics (training mode, biased var)."""
    mu = jnp.mean(x, axis=0, keepdims=True)
    var = jnp.mean(jnp.square(x - mu), axis=0, keepdims=True)
    xn = (x - mu) * jax.lax.rsqrt(var + EPS)
    if gamma is None:
        return xn
    return xn * gamma + beta


# ---------------------------------------------------------------------------
# Kernel 1: Conv3x3 (pad=1) + bias + ReLU + global average pool
# ---------------------------------------------------------------------------
def conv_pool_kernel(xp_ref, wc_ref, cb_ref, feats_ref, *,
                     tile_h, out_w, wp, c_in, inv_hw):
    # xp_ref   : (Hp, Wp*C) bf16  lane-dense zero-padded image of current sample
    # wc_ref   : (9*C, F_pad) bf16 im2col conv weight, rows ordered (di, dj, c)
    # cb_ref   : (1, F_pad) f32 conv bias (zero in padded columns)
    # feats_ref: (1, F_pad) f32 pooled features of current sample (accumulated)
    s = pl.program_id(1)
    last_s = pl.num_programs(1) - 1

    @pl.when(s == 0)
    def _():
        feats_ref[...] = jnp.zeros_like(feats_ref)

    r0 = s * tile_h
    if tile_h % 8 == 0:
        r0 = pl.multiple_of(r0, 8)

    # Lane-dense load of the halo window, then ONE unfold to (rows, Wp, C).
    win = xp_ref[pl.ds(r0, tile_h + 2), :]                 # (tile_h+2, Wp*C) bf16
    win3 = win.reshape(tile_h + 2, wp, c_in)               # single minor-split
    taps = [win3[di:di + tile_h, dj:dj + out_w, :]
            for di in range(3) for dj in range(3)]
    patch = jnp.concatenate(taps, axis=-1)                 # (tile_h, W, 9*C) bf16
    patch = patch.reshape(tile_h * out_w, 9 * c_in)

    y = jnp.dot(patch, wc_ref[...],
                preferred_element_type=jnp.float32)        # (rows, F_pad) f32
    y = jnp.maximum(y + cb_ref[...], 0.0)                  # bias + ReLU (f32)
    feats_ref[...] += jnp.sum(y, axis=0, keepdims=True)    # pooled partial sum

    @pl.when(s == last_s)
    def _():
        feats_ref[...] *= inv_hw                           # mean over H*W


# ---------------------------------------------------------------------------
# Kernel 2: proj / pred heads with full-batch BatchNorm (single invocation)
# ---------------------------------------------------------------------------
def heads_kernel(feats_ref, w1_ref, w2_ref, w3_ref, w4_ref, w5_ref, vec_ref,
                 proj_ref, pred_ref):
    # feats_ref: (N, F_pad) f32 pooled backbone features
    # w1..w5   : bf16 head weights, all dims padded to 128 multiples
    # vec_ref  : (8, V) f32 packed [g1, b1, g2, b2, b3, g4, b4, b5]
    p_pad = w1_ref.shape[1]
    d_pad = w3_ref.shape[1]
    pr_pad = w4_ref.shape[1]

    feats = feats_ref[...]

    def mm(a, w_ref):
        return jnp.dot(a.astype(jnp.bfloat16), w_ref[...],
                       preferred_element_type=jnp.float32)

    # proj: Lin(no bias)-BN-ReLU-Lin(no bias)-BN-ReLU-Lin(bias)-BN(affine=False)
    h = mm(feats, w1_ref)
    h = jnp.maximum(_bn_train(h, vec_ref[0:1, :p_pad], vec_ref[1:2, :p_pad]), 0.0)
    h = mm(h, w2_ref)
    h = jnp.maximum(_bn_train(h, vec_ref[2:3, :p_pad], vec_ref[3:4, :p_pad]), 0.0)
    h = mm(h, w3_ref) + vec_ref[4:5, :d_pad]
    proj = _bn_train(h)
    proj_ref[...] = proj
    # pred: Lin(no bias)-BN-ReLU-Lin(bias)
    p = mm(proj, w4_ref)
    p = jnp.maximum(_bn_train(p, vec_ref[5:6, :pr_pad], vec_ref[6:7, :pr_pad]), 0.0)
    pred_ref[...] = mm(p, w5_ref) + vec_ref[7:8, :d_pad]


# ---------------------------------------------------------------------------
# Glue / padding helpers
# ---------------------------------------------------------------------------
def _pad_to(a, axis, mult=128):
    pad = (-a.shape[axis]) % mult
    if pad == 0:
        return a
    widths = [(0, 0)] * a.ndim
    widths[axis] = (0, pad)
    return jnp.pad(a, widths)


def _pad_vec(v, width):
    return jnp.pad(v, (0, width - v.shape[0]))


def _pick_tile_h(h, w):
    """Whole image per step when small; else largest divisor of H with M~<=2048."""
    if h * w <= 4096:
        return h
    target = max(1, 2048 // max(w, 1))
    for t in range(min(h, target), 0, -1):
        if h % t == 0:
            return t
    return 1


def _vmem_limit_bytes():
    """Generation-aware VMEM budget: ~48 MiB on v7x, ~96 MiB on v5e/v6e."""
    cap = None
    try:
        info = pltpu.get_tpu_info()
        cap = int(getattr(info, "vmem_capacity_bytes"))
    except Exception:
        cap = None
    if not cap or cap <= 0:
        cap = 64 * 1024 * 1024  # conservative fallback (v7x-sized)
    return min(int(cap * 3 // 4), 100 * 1024 * 1024)


def network_forward(x, params):
    n, c, h, w = x.shape
    f = params["conv_w"].shape[0]
    p_dim = params["w1"].shape[0]
    d_dim = params["w3"].shape[1]
    assert p_dim == f, "backbone num_out must match proj input dim"

    tile_h = _pick_tile_h(h, w)
    s_tiles = h // tile_h
    hp, wp = h + 2, w + 2
    wpc = wp * c

    # Lane-dense, bf16, zero-padded image: (N, Hp, Wp*C).
    # TODO(synk): fold this transpose+pad into the kernel (build the halo in VMEM)
    # to remove one extra HBM pass over the image set.
    xp = jnp.pad(x.transpose(0, 2, 3, 1).astype(jnp.bfloat16),
                 ((0, 0), (1, 1), (1, 1), (0, 0))).reshape(n, hp, wpc)

    # Conv weight as im2col matrix, rows ordered (di, dj, c); F padded to 128.
    # K = 9*C deliberately NOT padded (not MXU-bound).
    w_conv = _pad_to(params["conv_w"].transpose(2, 3, 1, 0).reshape(9 * c, f),
                     1).astype(jnp.bfloat16)
    f_pad = w_conv.shape[1]
    conv_b = _pad_vec(params["conv_b"], f_pad).reshape(1, f_pad).astype(jnp.float32)

    # ---------------- Kernel 1: conv + pool (batch axis "parallel") ----------
    kern1 = functools.partial(conv_pool_kernel, tile_h=tile_h, out_w=w, wp=wp,
                              c_in=c, inv_hw=1.0 / float(h * w))
    const = lambda b, s: (0, 0)

    feats3 = pl.pallas_call(
        kern1,
        out_shape=jax.ShapeDtypeStruct((n, 1, f_pad), jnp.float32),
        grid_spec=pltpu.PrefetchScalarGridSpec(
            num_scalar_prefetch=0,
            grid=(n, s_tiles),
            in_specs=[
                # one lane-dense padded sample resident per batch step
                pl.BlockSpec((None, hp, wpc), lambda b, s: (b, 0, 0)),
                pl.BlockSpec(w_conv.shape, const),
                pl.BlockSpec((1, f_pad), const),
            ],
            out_specs=pl.BlockSpec((None, 1, f_pad), lambda b, s: (b, 0, 0)),
        ),
        compiler_params=pltpu.CompilerParams(
            # heads were split out -> no cross-batch dependency -> batch can be
            # sharded across v7x's two TensorCores.
            dimension_semantics=("parallel", "arbitrary"),
            vmem_limit_bytes=_vmem_limit_bytes(),
        ),
    )(xp, w_conv, conv_b)
    feats = feats3.reshape(n, f_pad)

    # ---------------- Kernel 2: fused proj / pred heads ----------------------
    # Head weights: pad every dim to a 128 multiple, cast to bf16.
    # NOTE: correctness relies on padded weight / bias / gamma columns being
    # exactly zero (jnp.pad) so BN on padded columns stays 0.
    w1 = _pad_to(_pad_to(params["w1"], 0), 1).astype(jnp.bfloat16)
    w2 = _pad_to(_pad_to(params["w2"], 0), 1).astype(jnp.bfloat16)
    w3 = _pad_to(_pad_to(params["w3"], 0), 1).astype(jnp.bfloat16)
    w4 = _pad_to(_pad_to(params["w4"], 0), 1).astype(jnp.bfloat16)
    w5 = _pad_to(_pad_to(params["w5"], 0), 1).astype(jnp.bfloat16)
    d_pad = w3.shape[1]
    pr_pad = w4.shape[1]

    vwidth = max(w1.shape[1], d_pad, pr_pad)
    vec = jnp.stack([
        _pad_vec(params["g1"], vwidth), _pad_vec(params["b1"], vwidth),
        _pad_vec(params["g2"], vwidth), _pad_vec(params["b2"], vwidth),
        _pad_vec(params["b3"], vwidth),
        _pad_vec(params["g4"], vwidth), _pad_vec(params["b4"], vwidth),
        _pad_vec(params["b5"], vwidth),
    ]).astype(jnp.float32)

    proj_p, pred_p = pl.pallas_call(
        heads_kernel,
        out_shape=(jax.ShapeDtypeStruct((n, d_pad), jnp.float32),
                   jax.ShapeDtypeStruct((n, d_pad), jnp.float32)),
    )(feats, w1, w2, w3, w4, w5, vec)

    return {"proj": proj_p[:, :d_dim], "pred": pred_p[:, :d_dim]}


# ---------------------------------------------------------------------------
# Pure-JAX reference (same math & bf16-matmul-input policy, no Pallas)
# ---------------------------------------------------------------------------
def network_forward_ref(x, params):
    xb = x.astype(jnp.bfloat16)
    wb = params["conv_w"].astype(jnp.bfloat16)
    y = jax.lax.conv_general_dilated(
        xb, wb, window_strides=(1, 1), padding="SAME",
        dimension_numbers=("NCHW", "OIHW", "NCHW"),
        preferred_element_type=jnp.float32)                   # (N, F, H, W)
    y = jnp.maximum(y + params["conv_b"][None, :, None, None], 0.0)
    feats = jnp.mean(y, axis=(2, 3))                          # (N, F)

    def mm(a, w):
        return jnp.dot(a.astype(jnp.bfloat16), w.astype(jnp.bfloat16),
                       preferred_element_type=jnp.float32)

    h = jnp.maximum(_bn_train(mm(feats, params["w1"]),
                              params["g1"][None, :], params["b1"][None, :]), 0.0)
    h = jnp.maximum(_bn_train(mm(h, params["w2"]),
                              params["g2"][None, :], params["b2"][None, :]), 0.0)
    proj = _bn_train(mm(h, params["w3"]) + params["b3"][None, :])
    p = jnp.maximum(_bn_train(mm(proj, params["w4"]),
                              params["g4"][None, :], params["b4"][None, :]), 0.0)
    pred = mm(p, params["w5"]) + params["b5"][None, :]
    return {"proj": proj, "pred": pred}


# ---------------------------------------------------------------------------
# Deterministic synthetic parameters
# ---------------------------------------------------------------------------
def make_params(key, c_in, num_out, dim, pred_dim):
    ks = jax.random.split(key, 16)

    def lin(k, din, dout):
        return jax.random.normal(k, (din, dout), jnp.float32) / jnp.sqrt(float(din))

    def gamma(k, m):
        return 1.0 + 0.1 * jax.random.normal(k, (m,), jnp.float32)

    def beta(k, m):
        return 0.1 * jax.random.normal(k, (m,), jnp.float32)

    return {
        "conv_w": jax.random.normal(ks[0], (num_out, c_in, 3, 3), jnp.float32)
                  / jnp.sqrt(9.0 * c_in),
        "conv_b": 0.1 * jax.random.normal(ks[1], (num_out,), jnp.float32),
        # proj head
        "w1": lin(ks[2], num_out, num_out), "g1": gamma(ks[3], num_out), "b1": beta(ks[4], num_out),
        "w2": lin(ks[5], num_out, num_out), "g2": gamma(ks[6], num_out), "b2": beta(ks[7], num_out),
        "w3": lin(ks[8], num_out, dim), "b3": beta(ks[9], dim),  # bias frozen in ref module, still used
        # pred head
        "w4": lin(ks[10], dim, pred_dim), "g4": gamma(ks[11], pred_dim), "b4": beta(ks[12], pred_dim),
        "w5": lin(ks[13], pred_dim, dim),
        "b5": 0.1 * jax.random.normal(ks[14], (dim,), jnp.float32),
    }


if __name__ == "__main__":
    # Small shapes consistent with the module (defaults dim=384, pred_dim=96, scaled down).
    N, C, H, W = 4, 4, 16, 16
    NUM_OUT = 32      # backbone.num_out (prev_dim)
    DIM = 64          # proj output dim
    PRED_DIM = 32     # pred hidden dim

    key = jax.random.PRNGKey(0)
    kx, kp = jax.random.split(key)
    x = jax.random.normal(kx, (N, C, H, W), jnp.float32)
    params = make_params(kp, C, NUM_OUT, DIM, PRED_DIM)

    out = jax.jit(network_forward)(x, params)
    jax.block_until_ready(out)

    ref = network_forward_ref(x, params)
    assert out["proj"].shape == (N, DIM) and out["pred"].shape == (N, DIM)
    assert bool(jnp.all(jnp.isfinite(out["proj"]))) and bool(jnp.all(jnp.isfinite(out["pred"])))
    # bf16 matmul inputs (f32 accumulation) => loosened tolerance vs. the reference.
    assert jnp.allclose(out["proj"], ref["proj"], atol=2e-2, rtol=2e-2), \
        float(jnp.max(jnp.abs(out["proj"] - ref["proj"])))
    assert jnp.allclose(out["pred"], ref["pred"], atol=2e-2, rtol=2e-2), \
        float(jnp.max(jnp.abs(out["pred"] - ref["pred"])))

    print("KERNEL_OK")
</pallas_src>

<mosaic_0001>
module attributes {stable_mosaic.version = 11 : i64} {
  func.func @conv_pool_kernel(%arg0: i32, %arg1: i32, %arg2: memref<1x18x72xbf16, #tpu.memory_space<vmem>>, %arg3: memref<36x128xbf16, #tpu.memory_space<vmem>>, %arg4: memref<1x128xf32, #tpu.memory_space<vmem>>, %arg5: memref<1x1x128xf32, #tpu.memory_space<vmem>>) attributes {dimension_semantics = [#tpu.dimension_semantics<parallel>, #tpu.dimension_semantics<arbitrary>], iteration_bounds = array<i64: 4, 1>, scalar_prefetch = 0 : i64, scratch_operands = 0 : i64, tpu.core_type = #tpu.core_type<tc>, window_params = [{transform_indices = @transform_0, window_bounds = array<i64: 1, 18, 72>}, {pipeline_mode = #tpu.pipeline_mode<synchronous>, transform_indices = @transform_1, window_bounds = array<i64: 36, 128>}, {pipeline_mode = #tpu.pipeline_mode<synchronous>, transform_indices = @transform_2, window_bounds = array<i64: 1, 128>}, {transform_indices = @transform_3, window_bounds = array<i64: 1, 1, 128>}]} {
    %c0_i32 = arith.constant 0 : i32
    %0 = arith.cmpi eq, %arg1, %c0_i32 : i32
    %1 = arith.extui %0 : i1 to i32
    %c0_i32_0 = arith.constant 0 : i32
    %2 = arith.cmpi ne, %1, %c0_i32_0 : i32
    scf.if %2 {
      %cst_16 = arith.constant 0.000000e+00 : f32
      %38 = vector.broadcast %cst_16 : f32 to vector<1x128xf32>
      %c0_17 = arith.constant 0 : index
      %c0_18 = arith.constant 0 : index
      %c0_19 = arith.constant 0 : index
      %39 = vector.load %arg5[%c0_17, %c0_18, %c0_19] : memref<1x1x128xf32, #tpu.memory_space<vmem>>, vector<1x1x128xf32>
      %40 = vector.shape_cast %39 : vector<1x1x128xf32> to vector<1x128xf32>
      %41 = vector.shape_cast %38 : vector<1x128xf32> to vector<1x1x128xf32>
      tpu.vector_store %arg5[%c0_17, %c0_18, %c0_19], %41 {strides = array<i32>} : memref<1x1x128xf32, #tpu.memory_space<vmem>>, vector<1x1x128xf32>,
    } else {
    }
    %c16_i32 = arith.constant 16 : i32
    %3 = arith.muli %arg1, %c16_i32 : i32
    %4 = tpu.assume_multiple %3, 8 : i32
    %c0 = arith.constant 0 : index
    %5 = arith.index_cast %4 : i32 to index
    %c0_1 = arith.constant 0 : index
    %6 = vector.load %arg2[%c0, %5, %c0_1] : memref<1x18x72xbf16, #tpu.memory_space<vmem>>, vector<1x18x72xbf16>
    %7 = vector.shape_cast %6 : vector<1x18x72xbf16> to vector<18x72xbf16>
    %8 = vector.shape_cast %7 : vector<18x72xbf16> to vector<18x18x4xbf16>
    %9 = vector.extract_strided_slice %8 {offsets = [0, 0, 0], sizes = [16, 16, 4], strides = [1, 1, 1]} : vector<18x18x4xbf16> to vector<16x16x4xbf16>
    %10 = vector.extract_strided_slice %8 {offsets = [0, 1, 0], sizes = [16, 16, 4], strides = [1, 1, 1]} : vector<18x18x4xbf16> to vector<16x16x4xbf16>
    %11 = vector.extract_strided_slice %8 {offsets = [0, 2, 0], sizes = [16, 16, 4], strides = [1, 1, 1]} : vector<18x18x4xbf16> to vector<16x16x4xbf16>
    %12 = vector.extract_strided_slice %8 {offsets = [1, 0, 0], sizes = [16, 16, 4], strides = [1, 1, 1]} : vector<18x18x4xbf16> to vector<16x16x4xbf16>
    %13 = vector.extract_strided_slice %8 {offsets = [1, 1, 0], sizes = [16, 16, 4], strides = [1, 1, 1]} : vector<18x18x4xbf16> to vector<16x16x4xbf16>
    %14 = vector.extract_strided_slice %8 {offsets = [1, 2, 0], sizes = [16, 16, 4], strides = [1, 1, 1]} : vector<18x18x4xbf16> to vector<16x16x4xbf16>
    %15 = vector.extract_strided_slice %8 {offsets = [2, 0, 0], sizes = [16, 16, 4], strides = [1, 1, 1]} : vector<18x18x4xbf16> to vector<16x16x4xbf16>
    %16 = vector.extract_strided_slice %8 {offsets = [2, 1, 0], sizes = [16, 16, 4], strides = [1, 1, 1]} : vector<18x18x4xbf16> to vector<16x16x4xbf16>
    %17 = vector.extract_strided_slice %8 {offsets = [2, 2, 0], sizes = [16, 16, 4], strides = [1, 1, 1]} : vector<18x18x4xbf16> to vector<16x16x4xbf16>
    %18 = tpu.concatenate %9, %10, %11, %12, %13, %14, %15, %16, %17 in 2 : vector<16x16x4xbf16>, vector<16x16x4xbf16>, vector<16x16x4xbf16>, vector<16x16x4xbf16>, vector<16x16x4xbf16>, vector<16x16x4xbf16>, vector<16x16x4xbf16>, vector<16x16x4xbf16>, vector<16x16x4xbf16> -> vector<16x16x36xbf16>
    %19 = vector.shape_cast %18 : vector<16x16x36xbf16> to vector<256x36xbf16>
    %c0_2 = arith.constant 0 : index
    %c0_3 = arith.constant 0 : index
    %20 = vector.load %arg3[%c0_2, %c0_3] : memref<36x128xbf16, #tpu.memory_space<vmem>>, vector<36x128xbf16>
    %cst = arith.constant dense<0.000000e+00> : vector<256x128xf32>
    %21 = tpu.matmul %19, %20, %cst {dimension_numbers = #tpu.dot_dimension_numbers<[1], [0], [0], [1], [0, 0, 1, 1], [], []>} : vector<256x36xbf16>, vector<36x128xbf16>, vector<256x128xf32> -> vector<256x128xf32>
    %c0_4 = arith.constant 0 : index
    %c0_5 = arith.constant 0 : index
    %22 = vector.load %arg4[%c0_4, %c0_5] : memref<1x128xf32, #tpu.memory_space<vmem>>, vector<1x128xf32>
    %23 = vector.broadcast %22 : vector<1x128xf32> to vector<256x128xf32>
    %24 = arith.addf %21, %23 : vector<256x128xf32>
    %cst_6 = arith.constant 0.000000e+00 : f32
    %25 = vector.broadcast %cst_6 : f32 to vector<256x128xf32>
    %26 = arith.maximumf %24, %25 : vector<256x128xf32>
    %c0_7 = arith.constant 0 : index
    %c0_8 = arith.constant 0 : index
    %c0_9 = arith.constant 0 : index
    %27 = vector.load %arg5[%c0_7, %c0_8, %c0_9] : memref<1x1x128xf32, #tpu.memory_space<vmem>>, vector<1x1x128xf32>
    %28 = vector.shape_cast %27 : vector<1x1x128xf32> to vector<1x128xf32>
    %cst_10 = arith.constant dense<0.000000e+00> : vector<128xf32>
    %29 = vector.multi_reduction <add>, %26, %cst_10 [0] : vector<256x128xf32> to vector<128xf32>
    %30 = vector.shape_cast %29 : vector<128xf32> to vector<1x128xf32>
    %31 = arith.addf %28, %30 : vector<1x128xf32>
    %c0_11 = arith.constant 0 : index
    %c0_12 = arith.constant 0 : index
    %c0_13 = arith.constant 0 : index
    %32 = vector.load %arg5[%c0_11, %c0_12, %c0_13] : memref<1x1x128xf32, #tpu.memory_space<vmem>>, vector<1x1x128xf32>
    %33 = vector.shape_cast %32 : vector<1x1x128xf32> to vector<1x128xf32>
    %34 = vector.shape_cast %31 : vector<1x128xf32> to vector<1x1x128xf32>
    tpu.vector_store %arg5[%c0_11, %c0_12, %c0_13], %34 {strides = array<i32>} : memref<1x1x128xf32, #tpu.memory_space<vmem>>, vector<1x1x128xf32>,
    %c0_i32_14 = arith.constant 0 : i32
    %35 = arith.cmpi eq, %arg1, %c0_i32_14 : i32
    %36 = arith.extui %35 : i1 to i32
    %c0_i32_15 = arith.constant 0 : i32
    %37 = arith.cmpi ne, %36, %c0_i32_15 : i32
    scf.if %37 {
      %c0_16 = arith.constant 0 : index
      %c0_17 = arith.constant 0 : index
      %c0_18 = arith.constant 0 : index
      %38 = vector.load %arg5[%c0_16, %c0_17, %c0_18] : memref<1x1x128xf32, #tpu.memory_space<vmem>>, vector<1x1x128xf32>
      %39 = vector.shape_cast %38 : vector<1x1x128xf32> to vector<1x128xf32>
      %cst_19 = arith.constant 3.906250e-03 : f32
      %40 = vector.broadcast %cst_19 : f32 to vector<1x128xf32>
      %41 = arith.mulf %39, %40 : vector<1x128xf32>
      %c0_20 = arith.constant 0 : index
      %c0_21 = arith.constant 0 : index
      %c0_22 = arith.constant 0 : index
      %42 = vector.load %arg5[%c0_20, %c0_21, %c0_22] : memref<1x1x128xf32, #tpu.memory_space<vmem>>, vector<1x1x128xf32>
      %43 = vector.shape_cast %42 : vector<1x1x128xf32> to vector<1x128xf32>
      %44 = vector.shape_cast %41 : vector<1x128xf32> to vector<1x1x128xf32>
      tpu.vector_store %arg5[%c0_20, %c0_21, %c0_22], %44 {strides = array<i32>} : memref<1x1x128xf32, #tpu.memory_space<vmem>>, vector<1x1x128xf32>,
    } else {
    }
    return
  }
  func.func @transform_0(%arg0: i32, %arg1: i32) -> (i32, i32, i32) {
    %c0_i32 = arith.constant 0 : i32
    %c0_i32_0 = arith.constant 0 : i32
    %c0_i32_1 = arith.constant 0 : i32
    return %arg0, %c0_i32, %c0_i32_0 : i32, i32, i32
  }
  func.func @transform_1(%arg0: i32, %arg1: i32) -> (i32, i32) {
    %c0_i32 = arith.constant 0 : i32
    %c0_i32_0 = arith.constant 0 : i32
    %c0_i32_1 = arith.constant 0 : i32
    return %c0_i32, %c0_i32_0 : i32, i32
  }
  func.func @transform_2(%arg0: i32, %arg1: i32) -> (i32, i32) {
    %c0_i32 = arith.constant 0 : i32
    %c0_i32_0 = arith.constant 0 : i32
    %c0_i32_1 = arith.constant 0 : i32
    return %c0_i32, %c0_i32_0 : i32, i32
  }
  func.func @transform_3(%arg0: i32, %arg1: i32) -> (i32, i32, i32) {
    %c0_i32 = arith.constant 0 : i32
    %c0_i32_0 = arith.constant 0 : i32
    %c0_i32_1 = arith.constant 0 : i32
    return %arg0, %c0_i32, %c0_i32_0 : i32, i32, i32
  }
}

module attributes {stable_mosaic.version = 11 : i64} {
  func.func @heads_kernel(%arg0: memref<4x128xf32, #tpu.memory_space<vmem>>, %arg1: memref<128x128xbf16, #tpu.memory_space<vmem>>, %arg2: memref<128x128xbf16, #tpu.memory_space<vmem>>, %arg3: memref<128x128xbf16, #tpu.memory_space<vmem>>, %arg4: memref<128x128xbf16, #tpu.memory_space<vmem>>, %arg5: memref<128x128xbf16, #tpu.memory_space<vmem>>, %arg6: memref<8x128xf32, #tpu.memory_space<vmem>>, %arg7: memref<4x128xf32, #tpu.memory_space<vmem>>, %arg8: memref<4x128xf32, #tpu.memory_space<vmem>>) attributes {dimension_semantics = [], scalar_prefetch = 0 : i64, scratch_operands = 0 : i64, tpu.core_type = #tpu.core_type<tc>} {
    %c0 = arith.constant 0 : index
    %c0_0 = arith.constant 0 : index
    %0 = vector.load %arg0[%c0, %c0_0] : memref<4x128xf32, #tpu.memory_space<vmem>>, vector<4x128xf32>
    %1 = arith.truncf %0 : vector<4x128xf32> to vector<4x128xbf16>
    %c0_1 = arith.constant 0 : index
    %c0_2 = arith.constant 0 : index
    %2 = vector.load %arg1[%c0_1, %c0_2] : memref<128x128xbf16, #tpu.memory_space<vmem>>, vector<128x128xbf16>
    %cst = arith.constant dense<0.000000e+00> : vector<4x128xf32>
    %3 = tpu.matmul %1, %2, %cst {dimension_numbers = #tpu.dot_dimension_numbers<[1], [0], [0], [1], [0, 0, 1, 1], [], []>} : vector<4x128xbf16>, vector<128x128xbf16>, vector<4x128xf32> -> vector<4x128xf32>
    %c0_3 = arith.constant 0 : index
    %c0_4 = arith.constant 0 : index
    %4 = vector.load %arg6[%c0_3, %c0_4] : memref<8x128xf32, #tpu.memory_space<vmem>>, vector<1x128xf32>
    %c1 = arith.constant 1 : index
    %c0_5 = arith.constant 0 : index
    %5 = vector.load %arg6[%c1, %c0_5] : memref<8x128xf32, #tpu.memory_space<vmem>>, vector<1x128xf32>
    %cst_6 = arith.constant dense<0.000000e+00> : vector<128xf32>
    %6 = vector.multi_reduction <add>, %3, %cst_6 [0] : vector<4x128xf32> to vector<128xf32>
    %7 = vector.shape_cast %6 : vector<128xf32> to vector<1x128xf32>
    %cst_7 = arith.constant 4.000000e+00 : f32
    %8 = vector.broadcast %cst_7 : f32 to vector<1x128xf32>
    %9 = arith.divf %7, %8 : vector<1x128xf32>
    %10 = vector.broadcast %9 : vector<1x128xf32> to vector<4x128xf32>
    %11 = arith.subf %3, %10 : vector<4x128xf32>
    %12 = arith.mulf %11, %11 : vector<4x128xf32>
    %cst_8 = arith.constant dense<0.000000e+00> : vector<128xf32>
    %13 = vector.multi_reduction <add>, %12, %cst_8 [0] : vector<4x128xf32> to vector<128xf32>
    %14 = vector.shape_cast %13 : vector<128xf32> to vector<1x128xf32>
    %cst_9 = arith.constant 4.000000e+00 : f32
    %15 = vector.broadcast %cst_9 : f32 to vector<1x128xf32>
    %16 = arith.divf %14, %15 : vector<1x128xf32>
    %17 = vector.broadcast %9 : vector<1x128xf32> to vector<4x128xf32>
    %18 = arith.subf %3, %17 : vector<4x128xf32>
    %cst_10 = arith.constant 9.99999974E-6 : f32
    %19 = vector.broadcast %cst_10 : f32 to vector<1x128xf32>
    %20 = arith.addf %16, %19 : vector<1x128xf32>
    %21 = math.rsqrt %20 : vector<1x128xf32>
    %22 = vector.broadcast %21 : vector<1x128xf32> to vector<4x128xf32>
    %23 = arith.mulf %18, %22 : vector<4x128xf32>
    %24 = vector.broadcast %4 : vector<1x128xf32> to vector<4x128xf32>
    %25 = arith.mulf %23, %24 : vector<4x128xf32>
    %26 = vector.broadcast %5 : vector<1x128xf32> to vector<4x128xf32>
    %27 = arith.addf %25, %26 : vector<4x128xf32>
    %cst_11 = arith.constant 0.000000e+00 : f32
    %28 = vector.broadcast %cst_11 : f32 to vector<4x128xf32>
    %29 = arith.maximumf %27, %28 : vector<4x128xf32>
    %30 = arith.truncf %29 : vector<4x128xf32> to vector<4x128xbf16>
    %c0_12 = arith.constant 0 : index
    %c0_13 = arith.constant 0 : index
    %31 = vector.load %arg2[%c0_12, %c0_13] : memref<128x128xbf16, #tpu.memory_space<vmem>>, vector<128x128xbf16>
    %cst_14 = arith.constant dense<0.000000e+00> : vector<4x128xf32>
    %32 = tpu.matmul %30, %31, %cst_14 {dimension_numbers = #tpu.dot_dimension_numbers<[1], [0], [0], [1], [0, 0, 1, 1], [], []>} : vector<4x128xbf16>, vector<128x128xbf16>, vector<4x128xf32> -> vector<4x128xf32>
    %c2 = arith.constant 2 : index
    %c0_15 = arith.constant 0 : index
    %33 = vector.load %arg6[%c2, %c0_15] : memref<8x128xf32, #tpu.memory_space<vmem>>, vector<1x128xf32>
    %c3 = arith.constant 3 : index
    %c0_16 = arith.constant 0 : index
    %34 = vector.load %arg6[%c3, %c0_16] : memref<8x128xf32, #tpu.memory_space<vmem>>, vector<1x128xf32>
    %cst_17 = arith.constant dense<0.000000e+00> : vector<128xf32>
    %35 = vector.multi_reduction <add>, %32, %cst_17 [0] : vector<4x128xf32> to vector<128xf32>
    %36 = vector.shape_cast %35 : vector<128xf32> to vector<1x128xf32>
    %cst_18 = arith.constant 4.000000e+00 : f32
    %37 = vector.broadcast %cst_18 : f32 to vector<1x128xf32>
    %38 = arith.divf %36, %37 : vector<1x128xf32>
    %39 = vector.broadcast %38 : vector<1x128xf32> to vector<4x128xf32>
    %40 = arith.subf %32, %39 : vector<4x128xf32>
    %41 = arith.mulf %40, %40 : vector<4x128xf32>
    %cst_19 = arith.constant dense<0.000000e+00> : vector<128xf32>
    %42 = vector.multi_reduction <add>, %41, %cst_19 [0] : vector<4x128xf32> to vector<128xf32>
    %43 = vector.shape_cast %42 : vector<128xf32> to vector<1x128xf32>
    %cst_20 = arith.constant 4.000000e+00 : f32
    %44 = vector.broadcast %cst_20 : f32 to vector<1x128xf32>
    %45 = arith.divf %43, %44 : vector<1x128xf32>
    %46 = vector.broadcast %38 : vector<1x128xf32> to vector<4x128xf32>
    %47 = arith.subf %32, %46 : vector<4x128xf32>
    %cst_21 = arith.constant 9.99999974E-6 : f32
    %48 = vector.broadcast %cst_21 : f32 to vector<1x128xf32>
    %49 = arith.addf %45, %48 : vector<1x128xf32>
    %50 = math.rsqrt %49 : vector<1x128xf32>
    %51 = vector.broadcast %50 : vector<1x128xf32> to vector<4x128xf32>
    %52 = arith.mulf %47, %51 : vector<4x128xf32>
    %53 = vector.broadcast %33 : vector<1x128xf32> to vector<4x128xf32>
    %54 = arith.mulf %52, %53 : vector<4x128xf32>
    %55 = vector.broadcast %34 : vector<1x128xf32> to vector<4x128xf32>
    %56 = arith.addf %54, %55 : vector<4x128xf32>
    %cst_22 = arith.constant 0.000000e+00 : f32
    %57 = vector.broadcast %cst_22 : f32 to vector<4x128xf32>
    %58 = arith.maximumf %56, %57 : vector<4x128xf32>
    %59 = arith.truncf %58 : vector<4x128xf32> to vector<4x128xbf16>
    %c0_23 = arith.constant 0 : index
    %c0_24 = arith.constant 0 : index
    %60 = vector.load %arg3[%c0_23, %c0_24] : memref<128x128xbf16, #tpu.memory_space<vmem>>, vector<128x128xbf16>
    %cst_25 = arith.constant dense<0.000000e+00> : vector<4x128xf32>
    %61 = tpu.matmul %59, %60, %cst_25 {dimension_numbers = #tpu.dot_dimension_numbers<[1], [0], [0], [1], [0, 0, 1, 1], [], []>} : vector<4x128xbf16>, vector<128x128xbf16>, vector<4x128xf32> -> vector<4x128xf32>
    %c4 = arith.constant 4 : index
    %c0_26 = arith.constant 0 : index
    %62 = vector.load %arg6[%c4, %c0_26] : memref<8x128xf32, #tpu.memory_space<vmem>>, vector<1x128xf32>
    %63 = vector.broadcast %62 : vector<1x128xf32> to vector<4x128xf32>
    %64 = arith.addf %61, %63 : vector<4x128xf32>
    %cst_27 = arith.constant dense<0.000000e+00> : vector<128xf32>
    %65 = vector.multi_reduction <add>, %64, %cst_27 [0] : vector<4x128xf32> to vector<128xf32>
    %66 = vector.shape_cast %65 : vector<128xf32> to vector<1x128xf32>
    %cst_28 = arith.constant 4.000000e+00 : f32
    %67 = vector.broadcast %cst_28 : f32 to vector<1x128xf32>
    %68 = arith.divf %66, %67 : vector<1x128xf32>
    %69 = vector.broadcast %68 : vector<1x128xf32> to vector<4x128xf32>
    %70 = arith.subf %64, %69 : vector<4x128xf32>
    %71 = arith.mulf %70, %70 : vector<4x128xf32>
    %cst_29 = arith.constant dense<0.000000e+00> : vector<128xf32>
    %72 = vector.multi_reduction <add>, %71, %cst_29 [0] : vector<4x128xf32> to vector<128xf32>
    %73 = vector.shape_cast %72 : vector<128xf32> to vector<1x128xf32>
    %cst_30 = arith.constant 4.000000e+00 : f32
    %74 = vector.broadcast %cst_30 : f32 to vector<1x128xf32>
    %75 = arith.divf %73, %74 : vector<1x128xf32>
    %76 = vector.broadcast %68 : vector<1x128xf32> to vector<4x128xf32>
    %77 = arith.subf %64, %76 : vector<4x128xf32>
    %cst_31 = arith.constant 9.99999974E-6 : f32
    %78 = vector.broadcast %cst_31 : f32 to vector<1x128xf32>
    %79 = arith.addf %75, %78 : vector<1x128xf32>
    %80 = math.rsqrt %79 : vector<1x128xf32>
    %81 = vector.broadcast %80 : vector<1x128xf32> to vector<4x128xf32>
    %82 = arith.mulf %77, %81 : vector<4x128xf32>
    %c0_32 = arith.constant 0 : index
    %c0_33 = arith.constant 0 : index
    %83 = vector.load %arg7[%c0_32, %c0_33] : memref<4x128xf32, #tpu.memory_space<vmem>>, vector<4x128xf32>
    tpu.vector_store %arg7[%c0_32, %c0_33], %82 {strides = array<i32>} : memref<4x128xf32, #tpu.memory_space<vmem>>, vector<4x128xf32>,
    %84 = arith.truncf %82 : vector<4x128xf32> to vector<4x128xbf16>
    %c0_34 = arith.constant 0 : index
    %c0_35 = arith.constant 0 : index
    %85 = vector.load %arg4[%c0_34, %c0_35] : memref<128x128xbf16, #tpu.memory_space<vmem>>, vector<128x128xbf16>
    %cst_36 = arith.constant dense<0.000000e+00> : vector<4x128xf32>
    %86 = tpu.matmul %84, %85, %cst_36 {dimension_numbers = #tpu.dot_dimension_numbers<[1], [0], [0], [1], [0, 0, 1, 1], [], []>} : vector<4x128xbf16>, vector<128x128xbf16>, vector<4x128xf32> -> vector<4x128xf32>
    %c5 = arith.constant 5 : index
    %c0_37 = arith.constant 0 : index
    %87 = vector.load %arg6[%c5, %c0_37] : memref<8x128xf32, #tpu.memory_space<vmem>>, vector<1x128xf32>
    %c6 = arith.constant 6 : index
    %c0_38 = arith.constant 0 : index
    %88 = vector.load %arg6[%c6, %c0_38] : memref<8x128xf32, #tpu.memory_space<vmem>>, vector<1x128xf32>
    %cst_39 = arith.constant dense<0.000000e+00> : vector<128xf32>
    %89 = vector.multi_reduction <add>, %86, %cst_39 [0] : vector<4x128xf32> to vector<128xf32>
    %90 = vector.shape_cast %89 : vector<128xf32> to vector<1x128xf32>
    %cst_40 = arith.constant 4.000000e+00 : f32
    %91 = vector.broadcast %cst_40 : f32 to vector<1x128xf32>
    %92 = arith.divf %90, %91 : vector<1x128xf32>
    %93 = vector.broadcast %92 : vector<1x128xf32> to vector<4x128xf32>
    %94 = arith.subf %86, %93 : vector<4x128xf32>
    %95 = arith.mulf %94, %94 : vector<4x128xf32>
    %cst_41 = arith.constant dense<0.000000e+00> : vector<128xf32>
    %96 = vector.multi_reduction <add>, %95, %cst_41 [0] : vector<4x128xf32> to vector<128xf32>
    %97 = vector.shape_cast %96 : vector<128xf32> to vector<1x128xf32>
    %cst_42 = arith.constant 4.000000e+00 : f32
    %98 = vector.broadcast %cst_42 : f32 to vector<1x128xf32>
    %99 = arith.divf %97, %98 : vector<1x128xf32>
    %100 = vector.broadcast %92 : vector<1x128xf32> to vector<4x128xf32>
    %101 = arith.subf %86, %100 : vector<4x128xf32>
    %cst_43 = arith.constant 9.99999974E-6 : f32
    %102 = vector.broadcast %cst_43 : f32 to vector<1x128xf32>
    %103 = arith.addf %99, %102 : vector<1x128xf32>
    %104 = math.rsqrt %103 : vector<1x128xf32>
    %105 = vector.broadcast %104 : vector<1x128xf32> to vector<4x128xf32>
    %106 = arith.mulf %101, %105 : vector<4x128xf32>
    %107 = vector.broadcast %87 : vector<1x128xf32> to vector<4x128xf32>
    %108 = arith.mulf %106, %107 : vector<4x128xf32>
    %109 = vector.broadcast %88 : vector<1x128xf32> to vector<4x128xf32>
    %110 = arith.addf %108, %109 : vector<4x128xf32>
    %cst_44 = arith.constant 0.000000e+00 : f32
    %111 = vector.broadcast %cst_44 : f32 to vector<4x128xf32>
    %112 = arith.maximumf %110, %111 : vector<4x128xf32>
    %113 = arith.truncf %112 : vector<4x128xf32> to vector<4x128xbf16>
    %c0_45 = arith.constant 0 : index
    %c0_46 = arith.constant 0 : index
    %114 = vector.load %arg5[%c0_45, %c0_46] : memref<128x128xbf16, #tpu.memory_space<vmem>>, vector<128x128xbf16>
    %cst_47 = arith.constant dense<0.000000e+00> : vector<4x128xf32>
    %115 = tpu.matmul %113, %114, %cst_47 {dimension_numbers = #tpu.dot_dimension_numbers<[1], [0], [0], [1], [0, 0, 1, 1], [], []>} : vector<4x128xbf16>, vector<128x128xbf16>, vector<4x128xf32> -> vector<4x128xf32>
    %c7 = arith.constant 7 : index
    %c0_48 = arith.constant 0 : index
    %116 = vector.load %arg6[%c7, %c0_48] : memref<8x128xf32, #tpu.memory_space<vmem>>, vector<1x128xf32>
    %117 = vector.broadcast %116 : vector<1x128xf32> to vector<4x128xf32>
    %118 = arith.addf %115, %117 : vector<4x128xf32>
    %c0_49 = arith.constant 0 : index
    %c0_50 = arith.constant 0 : index
    %119 = vector.load %arg8[%c0_49, %c0_50] : memref<4x128xf32, #tpu.memory_space<vmem>>, vector<4x128xf32>
    tpu.vector_store %arg8[%c0_49, %c0_50], %118 {strides = array<i32>} : memref<4x128xf32, #tpu.memory_space<vmem>>, vector<4x128xf32>,
    return
  }
}

</mosaic_0001>

<bundles_post_ra>
// kernel: network_forward.3
= control target key start
LH: loop header
LB: loop body
LE: loop exit
PB: predicated region body
PF: predicated region fallthrough
CT: control target
= control target key end

     0   :  { %14 = vsyncpa [#allocation3], 0  ;;  %v1015_v1 = vmov 0.0   ;;  %vm1016_vm0 = vmmov 0   ;;  %s1293_s0 = inlined_call_operand.vmem [shape: f32[4,128], index: 0, kind: input, shape index: {}]   ;;  %s1294_s1 = inlined_call_operand.vmem [shape: bf16[128,128], index: 1, kind: input, shape index: {}]   ;;  %s1295_s2 = inlined_call_operand.vmem [shape: bf16[128,128], index: 2, kind: input, shape index: {}]   ;;  %s1296_s3 = inlined_call_operand.vmem [shape: bf16[128,128], index: 3, kind: input, shape index: {}]   ;;  %s1297_s4 = inlined_call_operand.vmem [shape: bf16[128,128], index: 4, kind: input, shape index: {}]   ;;  %s1298_s5 = inlined_call_operand.vmem [shape: bf16[128,128], index: 5, kind: input, shape index: {}]   ;;  %s1299_s6 = inlined_call_operand.vmem [shape: f32[8,128], index: 6, kind: input, shape index: {}]   ;;  %s1300_s7 = inlined_call_operand.hbm [shape: f32[4,128], index: 7, kind: output, shape index: {0}]   ;;  %s1301_s8 = inlined_call_operand.hbm [shape: f32[4,128], index: 8, kind: output, shape index: {1}]  }
   0x1   :  { %v919_v0 = vld [vmem:[%s1294_s1] sm:$0xff]   ;;  %815 = vmatprep.subr.bf16.mxu0 %v1015_v1  ;;  %835 = vmatprep.subr.bf16.mxu1 %v1015_v1  ;;  %v920_v2 = vld [vmem:[%s1294_s1 + $0x8] sm:$0xff]   ;;  %v921_v3 = vld [vmem:[%s1294_s1 + $0x10] sm:$0xff]  }
   0x2   :  { %816 = vmatpush3.bf16.msra.mxu0 %v919_v0  ;;  %831 = vmatprep.mubr.msk.bf16.mxu0 %vm1016_vm0, %v1015_v1  ;;  %v922_v4 = vld [vmem:[%s1294_s1 + $0x18] sm:$0xff]   ;;  %v923_v5 = vld [vmem:[%s1294_s1 + $0x20] sm:$0xff]   ;;  %v924_v6 = vld [vmem:[%s1294_s1 + $0x28] sm:$0xff]  }
   0x3   :  { %817 = vmatprep.subr.bf16.mxu0 %v1015_v1  ;;  %851 = vmatprep.mubr.msk.bf16.mxu1 %vm1016_vm0, %v1015_v1  ;;  %v925_v7 = vld [vmem:[%s1294_s1 + $0x30] sm:$0xff]   ;;  %v926_v8 = vld [vmem:[%s1294_s1 + $0x38] sm:$0xff]   ;;  %v31_v9 = vld [vmem:[%s1293_s0] sm:$0xf] }
   0x4   :  { %v32_v10 = vpack.c.bf16 %v31_v9, %v31_v9 }
   0x6   :  { %818 = vmatpush3.bf16.msra.mxu0 %v920_v2 }
   0x7   :  { %819 = vmatprep.subr.bf16.mxu0 %v1015_v1 }
   0xa   :  { %820 = vmatpush3.bf16.msra.mxu0 %v921_v3 }
   0xb   :  { %821 = vmatprep.subr.bf16.mxu0 %v1015_v1 }
   0xe   :  { %822 = vmatpush3.bf16.msra.mxu0 %v922_v4 }
   0xf   :  { %823 = vmatprep.subr.bf16.mxu0 %v1015_v1 }
  0x12   :  { %824 = vmatpush3.bf16.msra.mxu0 %v923_v5 }
  0x13   :  { %825 = vmatprep.subr.bf16.mxu0 %v1015_v1 }
  0x16   :  { %826 = vmatpush3.bf16.msra.mxu0 %v924_v6 }
  0x17   :  { %827 = vmatprep.subr.bf16.mxu0 %v1015_v1 }
  0x1a   :  { %828 = vmatpush3.bf16.msra.mxu0 %v925_v7 }
  0x1b   :  { %829 = vmatprep.subr.bf16.mxu0 %v1015_v1 }
  0x1c   :  { %15 = vsyncpa [#allocation5], 0  ;;  %v927_v11 = vld [vmem:[%s1295_s2] sm:$0xff]   ;;  %v928_v12 = vld [vmem:[%s1295_s2 + $0x8] sm:$0xff]   ;;  %vm139_vm1 = vcmask 1043456   ;;  %s1017_s22 = smov [#allocation2]  }
  0x1d   :  { %836 = vmatpush3.bf16.msra.mxu1 %v927_v11  ;;  %v929_v13 = vld [vmem:[%s1295_s2 + $0x10] sm:$0xff]   ;;  %v930_v14 = vld [vmem:[%s1295_s2 + $0x18] sm:$0xff]   ;;  %v931_v15 = vld [vmem:[%s1295_s2 + $0x20] sm:$0xff]   ;;  %s700_s23 = sshll.u32 %s1017_s22, 4  ;;  %s701_s23 = int_to_ptr.vmem [resolvable:$true] %s700_s23 }
  0x1e   :  { %830 = vmatpush3.bf16.msra.mxu0 %v926_v8  ;;  %837 = vmatprep.subr.bf16.mxu1 %v1015_v1  ;;  %v932_v16 = vld [vmem:[%s1295_s2 + $0x28] sm:$0xff]   ;;  %v933_v17 = vld [vmem:[%s1295_s2 + $0x30] sm:$0xff]   ;;  %v934_v18 = vld [vmem:[%s1295_s2 + $0x38] sm:$0xff]   ;;  %s967_s24 = scalar_lea.vmem %s701_s23, 64  ;;  %p972_p1 = scmp.lt.s32.totalorder %s701_s23, %s701_s23 }
  0x1f   :  { %855 = vmatprep.subr.bf16.mxu0 %v1015_v1  ;;  %v730_v43 = vld [vmem:[%s1299_s6] ss:$0 sm:$0xff]  ;;  %v731_v45 = vld [vmem:[%s1299_s6 + $0x1] ss:$0 sm:$0xff]  ;;  %v936_v51 = vld [vmem:[%s1296_s3 + $0x8] sm:$0xff]   ;;  %p968_p0 = scmp.ne.s32.totalorder %s701_s23, %s967_s24  ;;  %p973_p2 = scmp.lt.s32.totalorder %s967_s24, %s967_s24 }
  0x20   :  { %v935_v50 = vld [vmem:[%s1296_s3] sm:$0xff]   ;;  %v937_v52 = vld [vmem:[%s1296_s3 + $0x10] sm:$0xff]   ;;  %v938_v53 = vld [vmem:[%s1296_s3 + $0x18] sm:$0xff]  }
  0x21   :  { %832 = vmatmul.mubr.bf16.vlgmr.msra.gmra.mrb[0].mxu0 %v32_v10  ;;  %838 = vmatpush3.bf16.msra.mxu1 %v928_v12  ;;  %v939_v54 = vld [vmem:[%s1296_s3 + $0x20] sm:$0xff]   ;;  %v940_v55 = vld [vmem:[%s1296_s3 + $0x28] sm:$0xff]   ;;  %v941_v56 = vld [vmem:[%s1296_s3 + $0x30] sm:$0xff]   ;;  %p974_p3 = por %p973_p2, %p972_p1 }
  0x22   :  { %871 = vmatprep.mubr.msk.bf16.mxu0 %vm1016_vm0, %v1015_v1  ;;  %839 = vmatprep.subr.bf16.mxu1 %v1015_v1  ;;  %v942_v57 = vld [vmem:[%s1296_s3 + $0x38] sm:$0xff]  }
  0x23   :  { %856 = vmatpush3.bf16.msra.mxu0 %v935_v50  ;;  %p975_p4 = pnand %p974_p3, %p968_p0 }
  0x24   :  { %857 = vmatprep.subr.bf16.mxu0 %v1015_v1 }
  0x25   :  { %840 = vmatpush3.bf16.msra.mxu1 %v929_v13 }
  0x26   :  { %841 = vmatprep.subr.bf16.mxu1 %v1015_v1 }
  0x27   :  { %858 = vmatpush3.bf16.msra.mxu0 %v936_v51 }
  0x28   :  { %859 = vmatprep.subr.bf16.mxu0 %v1015_v1 }
  0x29   :  { %842 = vmatpush3.bf16.msra.mxu1 %v930_v14 }
  0x2a   :  { %843 = vmatprep.subr.bf16.mxu1 %v1015_v1 }
  0x2b   :  { %860 = vmatpush3.bf16.msra.mxu0 %v937_v52 }
  0x2c   :  { %861 = vmatprep.subr.bf16.mxu0 %v1015_v1 }
  0x2d   :  { %844 = vmatpush3.bf16.msra.mxu1 %v931_v15 }
  0x2e   :  { %845 = vmatprep.subr.bf16.mxu1 %v1015_v1 }
  0x2f   :  { %862 = vmatpush3.bf16.msra.mxu0 %v938_v53 }
  0x30   :  { %863 = vmatprep.subr.bf16.mxu0 %v1015_v1 }
  0x31   :  { %846 = vmatpush3.bf16.msra.mxu1 %v932_v16 }
  0x32   :  { %847 = vmatprep.subr.bf16.mxu1 %v1015_v1 }
  0x33   :  { %864 = vmatpush3.bf16.msra.mxu0 %v939_v54 }
  0x34   :  { %865 = vmatprep.subr.bf16.mxu0 %v1015_v1 }
  0x35   :  { %848 = vmatpush3.bf16.msra.mxu1 %v933_v17 }
  0x36   :  { %849 = vmatprep.subr.bf16.mxu1 %v1015_v1 }
  0x37   :  { %866 = vmatpush3.bf16.msra.mxu0 %v940_v55 }
  0x38   :  { %867 = vmatprep.subr.bf16.mxu0 %v1015_v1 }
  0x39   :  { %850 = vmatpush3.bf16.msra.mxu1 %v934_v18 }
  0x3a   :  { %875 = vmatprep.subr.bf16.mxu1 %v1015_v1 }
  0x3b   :  { %868 = vmatpush3.bf16.msra.mxu0 %v941_v56 }
  0x3c   :  { %869 = vmatprep.subr.bf16.mxu0 %v1015_v1 }
  0x3f   :  { %870 = vmatpush3.bf16.msra.mxu0 %v942_v57 }
  0x40   :  { %895 = vmatprep.subr.bf16.mxu0 %v1015_v1 }
  0xf4   :  { %v131_v19 = vpop.f32.mrb[0].mxu0 }
  0xf5   :  { %v140_v20 = vsel %vm139_vm1, %v131_v19, 0.0  ;;  %v833_v21 = vpop.f32.mrb[1].mxu0 }
  0xf6   :  { %v141_v22 = vrot.slane %v140_v20, 4  ;;  %v134_v23 = vpop.f32.mrb[2].mxu0  ;;  %v741_v21 = vld [vmem:[%s1299_s6 + $0x3] ss:$0 sm:$0xff] }
  0xf7   :  { %v834_v24 = vpop.f32.mrb[3].mxu0 }
  0xf8   :  { %v142_v25 = vadd.f32 %v141_v22, %v140_v20 }
  0xfa   :  { %v143_v26 = vrot.slane %v142_v25, 2 }
  0xfc   :  { %v144_v27 = vadd.f32 %v143_v26, %v142_v25  ;;  %v943_v26 = vld [vmem:[%s1297_s4] sm:$0xff]  }
  0xfe   :  { %v145_v28 = vrot.slane %v144_v27, 1 }
 0x100   :  { %v146_v29 = vadd.f32 %v145_v28, %v144_v27  ;;  %v944_v27 = vld [vmem:[%s1297_s4 + $0x8] sm:$0xff]   ;;  %v945_v28 = vld [vmem:[%s1297_s4 + $0x10] sm:$0xff]  }
 0x102   :  { %v148_v30 = vmul.f32 0.25, %v146_v29  ;;  %v946_v29 = vld [vmem:[%s1297_s4 + $0x18] sm:$0xff]  }
 0x104   :  { %v149_v31 = vsub.f32 %v131_v19, %v148_v30  ;;  %v740_v19 = vld [vmem:[%s1299_s6 + $0x2] ss:$0 sm:$0xff] }
 0x105   :  { %v947_v30 = vld [vmem:[%s1297_s4 + $0x20] sm:$0xff]  }
 0x106   :  { %v150_v32 = vmul.f32 %v149_v31, %v149_v31 }
 0x108   :  { %v151_v33 = vsel %vm139_vm1, %v150_v32, 0.0  ;;  %v949_v32 = vld [vmem:[%s1297_s4 + $0x30] sm:$0xff]  }
 0x109   :  { %v152_v34 = vrot.slane %v151_v33, 4 }
 0x10b   :  { %v153_v35 = vadd.f32 %v152_v34, %v151_v33  ;;  %v950_v33 = vld [vmem:[%s1297_s4 + $0x38] sm:$0xff]   ;;  %v742_v34 = vld [vmem:[%s1299_s6 + $0x4] ss:$0 sm:$0xff] }
 0x10d   :  { %v154_v36 = vrot.slane %v153_v35, 2 }
 0x10f   :  { %v155_v37 = vadd.f32 %v154_v36, %v153_v35 }
 0x111   :  { %v156_v38 = vrot.slane %v155_v37, 1 }
 0x113   :  { %v157_v39 = vadd.f32 %v156_v38, %v155_v37 }
 0x115   :  { %v158_v40 = vmul.f32 0.25, %v157_v39 }
 0x117   :  { %v159_v41 = vadd.f32 1e-05, %v158_v40 }
 0x119   :  { %959 = vrsqrt.f32 %v159_v41 }
 0x123   :  { %v960_v42 = vpop.eup %959 }
 0x124   :  { %v161_v44 = vmul.f32 %v960_v42, %v149_v31  ;;  %v948_v31 = vld [vmem:[%s1297_s4 + $0x28] sm:$0xff]  }
 0x126   :  { %v166_v46 = vmul.f32 %v730_v43, %v161_v44 }
 0x128   :  { %v171_v47 = vadd.f32 %v731_v45, %v166_v46 }
 0x12a   :  { %v172_v48 = vmax.f32 %v171_v47, 0.0 }
 0x12c   :  { %v173_v49 = vpack.c.bf16 %v172_v48, %v172_v48 }
 0x12e   :  { %852 = vmatmul.mubr.bf16.vlgmr.msra.gmra.mrb[0].mxu1 %v173_v49 }
 0x12f   :  { %891 = vmatprep.mubr.msk.bf16.mxu1 %vm1016_vm0, %v1015_v1  ;;  %876 = vmatpush3.bf16.msra.mxu1 %v943_v26 }
 0x130   :  { %877 = vmatprep.subr.bf16.mxu1 %v1015_v1 }
 0x133   :  { %878 = vmatpush3.bf16.msra.mxu1 %v944_v27 }
 0x134   :  { %879 = vmatprep.subr.bf16.mxu1 %v1015_v1 }
 0x137   :  { %880 = vmatpush3.bf16.msra.mxu1 %v945_v28 }
 0x138   :  { %881 = vmatprep.subr.bf16.mxu1 %v1015_v1 }
 0x13b   :  { %882 = vmatpush3.bf16.msra.mxu1 %v946_v29 }
 0x13c   :  { %883 = vmatprep.subr.bf16.mxu1 %v1015_v1 }
 0x13f   :  { %884 = vmatpush3.bf16.msra.mxu1 %v947_v30  ;;  %v759_v30 = vld [vmem:[%s1299_s6 + $0x5] ss:$0 sm:$0xff] }
 0x140   :  { %885 = vmatprep.subr.bf16.mxu1 %v1015_v1 }
 0x143   :  { %886 = vmatpush3.bf16.msra.mxu1 %v948_v31 }
 0x144   :  { %887 = vmatprep.subr.bf16.mxu1 %v1015_v1 }
 0x147   :  { %888 = vmatpush3.bf16.msra.mxu1 %v949_v32  ;;  %v760_v32 = vld [vmem:[%s1299_s6 + $0x6] ss:$0 sm:$0xff] }
 0x148   :  { %889 = vmatprep.subr.bf16.mxu1 %v1015_v1 }
 0x14b   :  { %890 = vmatpush3.bf16.msra.mxu1 %v950_v33 }
 0x201   :  { %v272_v58 = vpop.f32.mrb[0].mxu1 }
 0x202   :  { %v280_v59 = vsel %vm139_vm1, %v272_v58, 0.0  ;;  %v853_v60 = vpop.f32.mrb[1].mxu1 }
 0x203   :  { %v281_v61 = vrot.slane %v280_v59, 4  ;;  %v275_v62 = vpop.f32.mrb[2].mxu1 }
 0x204   :  { %v854_v63 = vpop.f32.mrb[3].mxu1  ;;  %v951_v62 = vld [vmem:[%s1298_s5] sm:$0xff]  }
 0x205   :  { %v282_v0 = vadd.f32 %v281_v61, %v280_v59  ;;  %v952_v63 = vld [vmem:[%s1298_s5 + $0x8] sm:$0xff]  }
 0x207   :  { %v283_v2 = vrot.slane %v282_v0, 2 }
 0x209   :  { %v284_v3 = vadd.f32 %v283_v2, %v282_v0  ;;  %v953_v0 = vld [vmem:[%s1298_s5 + $0x10] sm:$0xff]   ;;  %v954_v2 = vld [vmem:[%s1298_s5 + $0x18] sm:$0xff]  }
 0x20b   :  { %v285_v4 = vrot.slane %v284_v3, 1 }
 0x20d   :  { %v286_v5 = vadd.f32 %v285_v4, %v284_v3  ;;  %v955_v3 = vld [vmem:[%s1298_s5 + $0x20] sm:$0xff]   ;;  %v956_v4 = vld [vmem:[%s1298_s5 + $0x28] sm:$0xff]  }
 0x20f   :  { %v287_v6 = vmul.f32 0.25, %v286_v5  ;;  %v957_v5 = vld [vmem:[%s1298_s5 + $0x30] sm:$0xff]  }
 0x211   :  { %v288_v7 = vsub.f32 %v272_v58, %v287_v6  ;;  %v958_v6 = vld [vmem:[%s1298_s5 + $0x38] sm:$0xff]  }
 0x213   :  { %v289_v8 = vmul.f32 %v288_v7, %v288_v7 }
 0x215   :  { %v290_v9 = vsel %vm139_vm1, %v289_v8, 0.0 }
 0x216   :  { %v291_v10 = vrot.slane %v290_v9, 4 }
 0x218   :  { %v292_v11 = vadd.f32 %v291_v10, %v290_v9 }
 0x21a   :  { %v293_v12 = vrot.slane %v292_v11, 2 }
 0x21c   :  { %v294_v13 = vadd.f32 %v293_v12, %v292_v11 }
 0x21e   :  { %v295_v14 = vrot.slane %v294_v13, 1 }
 0x220   :  { %v296_v15 = vadd.f32 %v295_v14, %v294_v13 }
 0x222   :  { %v297_v16 = vmul.f32 0.25, %v296_v15 }
 0x224   :  { %v298_v17 = vadd.f32 1e-05, %v297_v16 }
 0x226   :  { %961 = vrsqrt.f32 %v298_v17 }
 0x230   :  { %v962_v18 = vpop.eup %961 }
 0x231   :  { %v300_v20 = vmul.f32 %v962_v18, %v288_v7 }
 0x233   :  { %v305_v22 = vmul.f32 %v740_v19, %v300_v20 }
 0x235   :  { %v310_v23 = vadd.f32 %v741_v21, %v305_v22 }
 0x237   :  { %v311_v24 = vmax.f32 %v310_v23, 0.0 }
 0x239   :  { %v312_v25 = vpack.c.bf16 %v311_v24, %v311_v24 }
 0x23b   :  { %872 = vmatmul.mubr.bf16.vlgmr.msra.gmra.mrb[4].mxu0 %v312_v25 }
 0x23c   :  { %911 = vmatprep.mubr.msk.bf16.mxu0 %vm1016_vm0, %v1015_v1  ;;  %896 = vmatpush3.bf16.msra.mxu0 %v951_v62 }
 0x23d   :  { %897 = vmatprep.subr.bf16.mxu0 %v1015_v1 }
 0x240   :  { %898 = vmatpush3.bf16.msra.mxu0 %v952_v63 }
 0x241   :  { %899 = vmatprep.subr.bf16.mxu0 %v1015_v1 }
 0x244   :  { %900 = vmatpush3.bf16.msra.mxu0 %v953_v0 }
 0x245   :  { %901 = vmatprep.subr.bf16.mxu0 %v1015_v1 }
 0x248   :  { %902 = vmatpush3.bf16.msra.mxu0 %v954_v2 }
 0x249   :  { %903 = vmatprep.subr.bf16.mxu0 %v1015_v1 }
 0x24c   :  { %904 = vmatpush3.bf16.msra.mxu0 %v955_v3 }
 0x24d   :  { %905 = vmatprep.subr.bf16.mxu0 %v1015_v1 }
 0x250   :  { %906 = vmatpush3.bf16.msra.mxu0 %v956_v4 }
 0x251   :  { %907 = vmatprep.subr.bf16.mxu0 %v1015_v1 }
 0x254   :  { %908 = vmatpush3.bf16.msra.mxu0 %v957_v5 }
 0x255   :  { %909 = vmatprep.subr.bf16.mxu0 %v1015_v1 }
 0x258   :  { %910 = vmatpush3.bf16.msra.mxu0 %v958_v6 }
 0x30e   :  { %v416_v35 = vpop.f32.mrb[4].mxu0 }
 0x30f   :  { %v417_v36 = vadd.f32 %v742_v34, %v416_v35  ;;  %v873_v37 = vpop.f32.mrb[5].mxu0 }
 0x310   :  { %v419_v38 = vpop.f32.mrb[6].mxu0 }
 0x311   :  { %v422_v39 = vsel %vm139_vm1, %v417_v36, 0.0  ;;  %v874_v40 = vpop.f32.mrb[7].mxu0 }
 0x312   :  { %v423_v41 = vrot.slane %v422_v39, 4 }
 0x314   :  { %v424_v42 = vadd.f32 %v423_v41, %v422_v39 }
 0x316   :  { %v425_v43 = vrot.slane %v424_v42, 2 }
 0x318   :  { %v426_v44 = vadd.f32 %v425_v43, %v424_v42 }
 0x31a   :  { %v427_v45 = vrot.slane %v426_v44, 1 }
 0x31c   :  { %v428_v46 = vadd.f32 %v427_v45, %v426_v44 }
 0x31e   :  { %v429_v47 = vmul.f32 0.25, %v428_v46 }
 0x320   :  { %v430_v48 = vsub.f32 %v417_v36, %v429_v47 }
 0x322   :  { %v431_v49 = vmul.f32 %v430_v48, %v430_v48 }
 0x324   :  { %v432_v50 = vsel %vm139_vm1, %v431_v49, 0.0 }
 0x325   :  { %v433_v51 = vrot.slane %v432_v50, 4 }
 0x327   :  { %v434_v52 = vadd.f32 %v433_v51, %v432_v50 }
 0x329   :  { %v435_v53 = vrot.slane %v434_v52, 2 }
 0x32b   :  { %v436_v54 = vadd.f32 %v435_v53, %v434_v52 }
 0x32d   :  { %v437_v55 = vrot.slane %v436_v54, 1 }
 0x32f   :  { %v438_v56 = vadd.f32 %v437_v55, %v436_v54 }
 0x331   :  { %v439_v57 = vmul.f32 0.25, %v438_v56 }
 0x333   :  { %v440_v58 = vadd.f32 1e-05, %v439_v57 }
 0x335   :  { %963 = vrsqrt.f32 %v440_v58 }
 0x33f   :  { %v964_v59 = vpop.eup %963 }
 0x340   :  { %v442_v60 = vmul.f32 %v964_v59, %v430_v48 }
 0x342   :  { %v444_v61 = vpack.c.bf16 %v442_v60, %v442_v60  ;;  %443 = vst [vmem:[#allocation2] sm:$0xf] %v442_v60 }
 0x344   :  { %892 = vmatmul.mubr.bf16.vlgmr.msra.gmra.mrb[4].mxu1 %v444_v61 }
 0x417   :  { %v543_v7 = vpop.f32.mrb[4].mxu1 }
 0x418   :  { %v551_v8 = vsel %vm139_vm1, %v543_v7, 0.0  ;;  %v893_v9 = vpop.f32.mrb[5].mxu1 }
 0x419   :  { %v552_v10 = vrot.slane %v551_v8, 4  ;;  %v546_v11 = vpop.f32.mrb[6].mxu1 }
 0x41a   :  { %v894_v12 = vpop.f32.mrb[7].mxu1 }
 0x41b   :  { %v553_v13 = vadd.f32 %v552_v10, %v551_v8 }
 0x41d   :  { %v554_v14 = vrot.slane %v553_v13, 2 }
 0x41f   :  { %v555_v15 = vadd.f32 %v554_v14, %v553_v13 }
 0x421   :  { %v556_v16 = vrot.slane %v555_v15, 1 }
 0x423   :  { %v557_v17 = vadd.f32 %v556_v16, %v555_v15 }
 0x425   :  { %v558_v18 = vmul.f32 0.25, %v557_v17 }
 0x427   :  { %v559_v19 = vsub.f32 %v543_v7, %v558_v18 }
 0x429   :  { %v560_v1 = vmul.f32 %v559_v19, %v559_v19 }
 0x42b   :  { %v561_v20 = vsel %vm139_vm1, %v560_v1, 0.0 }
 0x42c   :  { %v562_v21 = vrot.slane %v561_v20, 4 }
 0x42e   :  { %v563_v22 = vadd.f32 %v562_v21, %v561_v20 }
 0x430   :  { %v564_v23 = vrot.slane %v563_v22, 2 }
 0x432   :  { %v565_v24 = vadd.f32 %v564_v23, %v563_v22 }
 0x434   :  { %v566_v25 = vrot.slane %v565_v24, 1 }
 0x436   :  { %v567_v26 = vadd.f32 %v566_v25, %v565_v24 }
 0x438   :  { %v568_v27 = vmul.f32 0.25, %v567_v26 }
 0x43a   :  { %v569_v28 = vadd.f32 1e-05, %v568_v27 }
 0x43c   :  { %965 = vrsqrt.f32 %v569_v28 }
 0x446   :  { %v966_v29 = vpop.eup %965 }
 0x447   :  { %v571_v31 = vmul.f32 %v966_v29, %v559_v19 }
 0x449   :  { %v576_v33 = vmul.f32 %v759_v30, %v571_v31 }
 0x44b   :  { %v581_v34 = vadd.f32 %v760_v32, %v576_v33 }
 0x44d   :  { %v582_v35 = vmax.f32 %v581_v34, 0.0 }
 0x44f   :  { %v583_v36 = vpack.c.bf16 %v582_v35, %v582_v35 }
 0x451   :  { %912 = vmatmul.mubr.bf16.vlgmr.msra.gmra.mrb[8].mxu0 %v583_v36 }
 0x452   :  { %978 = shalt.err (!%p975_p4)
}
 0x453   :  { %s979_s25 = scalar_lea.hbm %s1300_s7, 64 }
 0x454   :  { %p980_p5 = scmp.ne.s32.totalorder %s1300_s7, %s979_s25  ;;  %p983_p6 = scmp.lt.u32.totalorder %s979_s25, %s1300_s7 }
 0x456   :  { %p985_p7 = pnand %p983_p6, %p980_p5 }
 0x458   :  { %988 = shalt.err (!%p985_p7)
}
 0x459   :  { %703 = dma.vmem_to_hbm [thread:$0]  %s701_s23, 64, %s1300_s7, [#allocation3]   ;;  %v761_v37 = vld [vmem:[%s1299_s6 + $0x7] ss:$0 sm:$0xff] }
 0x45a   :  { %s1018_s10 = smov [#allocation4]  }
 0x45b   :  { %s710_s11 = sshll.u32 %s1018_s10, 4  ;;  %s711_s11 = int_to_ptr.vmem [resolvable:$true] %s710_s11 }
 0x45c   :  { %s989_s12 = scalar_lea.vmem %s711_s11, 64  ;;  %p994_p9 = scmp.lt.s32.totalorder %s711_s11, %s711_s11 }
 0x45d   :  { %p990_p8 = scmp.ne.s32.totalorder %s711_s11, %s989_s12  ;;  %p995_p10 = scmp.lt.s32.totalorder %s989_s12, %s989_s12 }
 0x45f   :  { %p996_p11 = por %p995_p10, %p994_p9 }
 0x461   :  { %p997_p12 = pnand %p996_p11, %p990_p8 }
 0x524   :  { %v687_v38 = vpop.f32.mrb[8].mxu0 }
 0x525   :  { %v688_v39 = vadd.f32 %v761_v37, %v687_v38  ;;  %v913_v40 = vpop.f32.mrb[9].mxu0 }
 0x526   :  { %v690_v41 = vpop.f32.mrb[10].mxu0 }
 0x527   :  { %693 = vst [vmem:[#allocation4] sm:$0xf] %v688_v39  ;;  %v914_v42 = vpop.f32.mrb[11].mxu0 }
 0x528   :  { %1000 = shalt.err (!%p997_p12)
}
 0x529   :  { %s1001_s6 = scalar_lea.hbm %s1301_s8, 64 }
 0x52a   :  { %p1002_p13 = scmp.ne.s32.totalorder %s1301_s8, %s1001_s6  ;;  %p1005_p0 = scmp.lt.u32.totalorder %s1001_s6, %s1301_s8 }
 0x52c   :  { %p1007_p1 = pnand %p1005_p0, %p1002_p13 }
 0x52e   :  { %1010 = shalt.err (!%p1007_p1)
}
 0x52f   :  { %713 = dma.vmem_to_hbm [thread:$0]  %s711_s11, 64, %s1301_s8, [#allocation5]  }
 0x530   :  { %1011 = dma.done.wait [#allocation3], 64  }
 0x531   :  { %1012 = vsyncadd [#allocation3], 4294967232 }
 0x532   :  { %1013 = dma.done.wait [#allocation5], 64  }
 0x533   :  { %1014 = vsyncadd [#allocation5], 4294967232 }
 0x534   :  { %720 = vsyncpa [#allocation3], 1 }
 0x535   :  { %721 = vsyncpa [#allocation5], 1 }

// kernel: network_forward.2
= control target key start
LH: loop header
LB: loop body
LE: loop exit
PB: predicated region body
PF: predicated region fallthrough
CT: control target
= control target key end

     0   :  { %s2475_s12 = smov 0   ;;  %s2477_s13 = smov 0   ;;  %s3578_s0 = inlined_call_operand.vmem [shape: bf16[4,18,72], index: 0, kind: input, shape index: {}]   ;;  %s3579_s1 = inlined_call_operand.vmem [shape: bf16[36,128], index: 1, kind: input, shape index: {}]   ;;  %s3580_s2 = inlined_call_operand.vmem [shape: f32[1,128], index: 2, kind: input, shape index: {}]   ;;  %s3581_s3 = inlined_call_operand.vmem [shape: f32[4,1,128], index: 3, kind: output, shape index: {}]  }
   0x1   :  { %s2479_s14 = smov 0  }
   0x2 LB: > { %s25_s15 = sadd.s32 1, %s2420_s13  ;;  %p2219_p0 = scmp.ge.s32.totalorder %s2424_s14, 1  ;;  %s2424_s14 = sphi %s2479_s14, %s13_s14   ;;  %s2420_s13 = sphi %s2477_s13, %s3598_s13   ;;  %s2416_s12 = sphi %s2475_s12, %s3597_s12  }
   0x3   : > { %p27_p1 = scmp.ge.s32.totalorder %s25_s15, 4  ;;  %p149_p2 = scmp.lt.s32.totalorder %s2424_s14, 5 }
   0x5   : > { %s3600_s15 = smov (%p27_p1, %s25_s15), 0  ;;  %p150_p3 = pnand %p2219_p0, %p149_p2 }
   0x7   : > { %153 = sbr.rel (%p150_p3) target bundleno = 798 (0x31e), region = 32 }
   0xe   : > { %p171_p4 = scmp.lt.s32.totalorder %s2416_s12, 3  ;;  %s2426_s20 = smov 116   ;;  %v2443_v3 = vmov 1983009808   ;;  %v347_v5 = vlaneseq  ;;  %v2444_v12 = vmov 1934713408  }
   0xf   : > { %s2427_s21 = smov 124   ;;  %s2428_s22 = smov 112   ;;  %v345_v4 = vunpack.c.l.s4 %v2443_v3  ;;  %v362_v13 = vunpack.c.l.s4 %v2444_v12  ;;  %v3582_v34 = vmov 0   ;;  %vm1278_vm0 = vcmask 1046528  }
  0x10   : > { %s3602_s12 = smov (!%p171_p4, %s2416_s12), 3  ;;  %s2429_s23 = smov 120   ;;  %v348_v9 = vshrl.u32 %v347_v5, 7  ;;  %vm1053_vm1 = vsmask.f32 7424  ;;  %vm1915_vm2 = vcmask 1041408  }
  0x11   : > { %s2344_s16 = smul.u32 12, %s3602_s12  ;;  %s2430_s24 = smov 104   ;;  %v346_v8 = vunpack.c.0.s8 %v345_v4  ;;  %v363_v16 = vunpack.c.0.s8 %v362_v13  ;;  %vm1591_vm3 = vcmask 31744   ;;  %vm1624_vm4 = vcmask 64512  }
  0x12   : > { %s2431_s25 = smov 108   ;;  %s2432_s26 = smov 96   ;;  %vm1657_vm5 = vcmask 97280   ;;  %vm1690_vm6 = vcmask 130048   ;;  %vm1723_vm7 = vcmask 162816   ;;  %vm1756_vm8 = vcmask 195584  }
  0x13   : > { %s2499_s19 = scalar_lea.vmem %s3578_s0, %s2344_s16  ;;  %s2433_s27 = smov 100   ;;  %v2593_v14 = vsub.s32 %v346_v8, %v348_v9  ;;  %v2598_v22 = vsub.s32 %v363_v16, %v348_v9  ;;  %vm1789_vm9 = vcmask 228352   ;;  %vm1822_vm10 = vcmask 261120  }
  0x14   : > { %v2502_v0 = vld [vmem:[%s2499_s19] sm:$0xf]  ;;  %s2434_s28 = smov 88   ;;  %s2435_s29 = smov 92   ;;  %v2537_v1 = vld [vmem:[%s2499_s19 + $0x4] sm:$0xf] }
  0x15   : > { %214 = vrot.lane.b32.xlu1 %v2502_v0, %s2426_s20  ;;  %196 = vrot.lane.b32.xlu0 %v2502_v0, %s2427_s21  ;;  %s2436_s30 = smov 80   ;;  %s2437_s4 = smov 84   ;;  %v192_v2 = vld [vmem:[%s2499_s19 + $0x8] sm:$0x1]  ;;  %vm1882_vm11 = vcmask 293888  }
  0x16   : > { %s2438_s5 = smov 72   ;;  %s2439_s6 = smov 76  }
  0x17   : > { %s2440_s7 = smov 68   ;;  %s2441_s8 = smov 64  }
  0x18   : > { %s2442_s9 = smov 60   ;;  %s2446_s10 = smov 12  }
  0x19   : > { %223 = vrot.lane.b32.xlu1 %v2502_v0, %s2428_s22  ;;  %205 = vrot.lane.b32.xlu0 %v2502_v0, %s2429_s23  ;;  %s2447_s11 = smov 24   ;;  %s2448_s16 = smov 8  }
  0x1a   : > { %s2449_s17 = smov 20  }
  0x1d   : > { %241 = vrot.lane.b32.xlu1 %v2502_v0, %s2430_s24  ;;  %232 = vrot.lane.b32.xlu0 %v2502_v0, %s2431_s25 }
  0x21   : > { %259 = vrot.lane.b32.xlu1 %v2502_v0, %s2432_s26  ;;  %250 = vrot.lane.b32.xlu0 %v2502_v0, %s2433_s27 }
  0x25   : > { %277 = vrot.lane.b32.xlu1 %v2502_v0, %s2434_s28  ;;  %268 = vrot.lane.b32.xlu0 %v2502_v0, %s2435_s29 }
  0x29   : > { %295 = vrot.lane.b32.xlu1 %v2502_v0, %s2436_s30  ;;  %286 = vrot.lane.b32.xlu0 %v2502_v0, %s2437_s4 }
  0x2d   : > { %313 = vrot.lane.b32.xlu1 %v2502_v0, %s2438_s5  ;;  %304 = vrot.lane.b32.xlu0 %v2502_v0, %s2439_s6 }
  0x31   : > { %322 = vrot.lane.b32.xlu0 %v2502_v0, %s2440_s7  ;;  %331 = vrot.lane.b32.xlu1 %v2502_v0, %s2441_s8 }
  0x35   : > { %337 = vrot.lane.b32.xlu0 %v2502_v0, %s2442_s9  ;;  %198 = vrot.lane.b32.xlu1 %v2537_v1, %s2427_s21 }
  0x39   : > { %207 = vrot.lane.b32.xlu0 %v2537_v1, %s2429_s23  ;;  %216 = vrot.lane.b32.xlu1 %v2537_v1, %s2426_s20 }
  0x3d   : > { %225 = vrot.lane.b32.xlu0 %v2537_v1, %s2428_s22  ;;  %234 = vrot.lane.b32.xlu1 %v2537_v1, %s2431_s25 }
  0x41   : > { %243 = vrot.lane.b32.xlu0 %v2537_v1, %s2430_s24  ;;  %252 = vrot.lane.b32.xlu1 %v2537_v1, %s2433_s27 }
  0x45   : > { %261 = vrot.lane.b32.xlu0 %v2537_v1, %s2432_s26  ;;  %270 = vrot.lane.b32.xlu1 %v2537_v1, %s2435_s29 }
  0x49   : > { %279 = vrot.lane.b32.xlu0 %v2537_v1, %s2434_s28  ;;  %288 = vrot.lane.b32.xlu1 %v2537_v1, %s2437_s4 }
  0x4d   : > { %297 = vrot.lane.b32.xlu0 %v2537_v1, %s2436_s30  ;;  %306 = vrot.lane.b32.xlu1 %v2537_v1, %s2439_s6 }
  0x51   : > { %315 = vrot.lane.b32.xlu0 %v2537_v1, %s2438_s5  ;;  %324 = vrot.lane.b32.xlu1 %v2537_v1, %s2440_s7 }
  0x55   : > { %333 = vrot.lane.b32.xlu0 %v2537_v1, %s2441_s8  ;;  %339 = vrot.lane.b32.xlu1 %v2537_v1, %s2442_s9 }
  0x59   : > { %200 = vrot.lane.b32.xlu0 %v192_v2, %s2427_s21  ;;  %209 = vrot.lane.b32.xlu1 %v192_v2, %s2429_s23  ;;  %s2450_s21 = smov 4  }
  0x5d   : > { %218 = vrot.lane.b32.xlu0 %v192_v2, %s2426_s20  ;;  %227 = vrot.lane.b32.xlu1 %v192_v2, %s2428_s22  ;;  %s2451_s22 = smov 32  }
  0x61   : > { %236 = vrot.lane.b32.xlu0 %v192_v2, %s2431_s25  ;;  %245 = vrot.lane.b32.xlu1 %v192_v2, %s2430_s24  ;;  %s2452_s25 = smov 16  }
  0x65   : > { %254 = vrot.lane.b32.xlu0 %v192_v2, %s2433_s27  ;;  %263 = vrot.lane.b32.xlu1 %v192_v2, %s2432_s26  ;;  %s2453_s26 = smov 28  }
  0x69   : > { %272 = vrot.lane.b32.xlu0 %v192_v2, %s2435_s29  ;;  %281 = vrot.lane.b32.xlu1 %v192_v2, %s2434_s28 }
  0x6d   : > { %290 = vrot.lane.b32.xlu0 %v192_v2, %s2437_s4  ;;  %299 = vrot.lane.b32.xlu1 %v192_v2, %s2436_s30 }
  0x71   : > { %308 = vrot.lane.b32.xlu0 %v192_v2, %s2439_s6  ;;  %317 = vrot.lane.b32.xlu1 %v192_v2, %s2438_s5  ;;  %s3543_s5 = scalar_lea.vmem %s3581_s3, %s3602_s12 }
  0x75   : > { %326 = vrot.lane.b32.xlu0 %v192_v2, %s2440_s7  ;;  %335 = vrot.lane.b32.xlu1 %v192_v2, %s2441_s8 }
  0x79   : > { %341 = vrot.lane.b32.xlu0 %v192_v2, %s2442_s9 }
  0x87   : > { %v215_v6 = vpop.permute.xlu1 %214  ;;  %v197_v7 = vpop.permute.xlu0 %196 }
  0x8b   : > { %v224_v10 = vpop.permute.xlu1 %223  ;;  %v206_v11 = vpop.permute.xlu0 %205 }
  0x8c   : > { %v343_v15 = vcombine.low %v2502_v0, %v224_v10 }
  0x8e   : > { %v350_v19 = vrot.slane %v343_v15, %v2593_v14 }
  0x8f   : > { %v242_v17 = vpop.permute.xlu1 %241  ;;  %v233_v18 = vpop.permute.xlu0 %232 }
  0x90   : > { %v351_v20 = vcombine.low %v206_v11, %v242_v17  ;;  %v377_v23 = vcombine.low %v197_v7, %v233_v18 }
  0x92   : > { %v358_v21 = vrot.slane %v351_v20, %v2593_v14  ;;  %v384_v30 = vrot.slane %v377_v23, %v2593_v14 }
  0x93   : > { %v260_v24 = vpop.permute.xlu1 %259  ;;  %v251_v25 = vpop.permute.xlu0 %250 }
  0x94   : > { %v360_v26 = vcombine.high %v350_v19, %v358_v21  ;;  %v385_v27 = vcombine.low %v215_v6, %v251_v25  ;;  %v359_v46 = vcombine.low %v350_v19, %v358_v21 }
  0x96   : > { %v392_v28 = vrot.slane %v385_v27, %v2593_v14  ;;  %v2602_v29 = vrot.slane %v360_v26, %v2598_v22  ;;  %v2625_v55 = vrot.slane %v359_v46, %v2598_v22 }
  0x97   : > { %v278_v31 = vpop.permute.xlu1 %277  ;;  %v269_v32 = vpop.permute.xlu0 %268 }
  0x98   : > { %v394_v33 = vcombine.high %v384_v30, %v392_v28  ;;  %v2607_v35 = vcombine.high %v2602_v29, %v3582_v34  ;;  %v393_v48 = vcombine.low %v384_v30, %v392_v28  ;;  %v375_v3 = vcombine.high %v2625_v55, %v3582_v34 }
  0x99   : > { %v814_v11 = vshrl.u32 %v2625_v55, 16 }
  0x9a   : > { %v2610_v36 = vrot.slane %v394_v33, %v2598_v22  ;;  %v832_v41 = vshrl.u32 %v2607_v35, 16  ;;  %v2628_v58 = vrot.slane %v393_v48, %v2598_v22  ;;  %v820_v17 = vshrl.u32 %v375_v3, 16 }
  0x9b   : > { %v296_v37 = vpop.permute.xlu1 %295  ;;  %v287_v38 = vpop.permute.xlu0 %286 }
  0x9c   : > { %v2614_v39 = vcombine.high %v2610_v36, %v3582_v34  ;;  %v411_v40 = vcombine.low %v260_v24, %v296_v37  ;;  %v409_v4 = vcombine.high %v2628_v58, %v3582_v34  ;;  %v813_v18 = vpack.i.b16 %v2628_v58, %v2625_v55 }
  0x9d   : > { %v815_v19 = vshrl.u32 %v2628_v58, 16  ;;  %v825_v23 = vpack.i.b16 %v2610_v36, %v2602_v29 }
  0x9e   : > { %v831_v42 = vpack.i.b16 %v2614_v39, %v2607_v35  ;;  %v833_v43 = vshrl.u32 %v2614_v39, 16  ;;  %v418_v50 = vrot.slane %v411_v40, %v2593_v14  ;;  %v819_v21 = vpack.i.b16 %v409_v4, %v375_v3 }
  0x9f   : > { %v314_v44 = vpop.permute.xlu1 %313  ;;  %v305_v45 = vpop.permute.xlu0 %304  ;;  %v816_v55 = vpack.i.b16 %v815_v19, %v814_v11 }
  0xa0   : > { %v419_v47 = vcombine.low %v278_v31, %v314_v44  ;;  %v2620_v49 = vpack.i.b16 %v833_v43, %v832_v41  ;;  %v445_v52 = vcombine.low %v269_v32, %v305_v45  ;;  %v821_v44 = vshrl.u32 %v409_v4, 16 }
  0xa2   : > { %v426_v51 = vrot.slane %v419_v47, %v2593_v14  ;;  %v452_v63 = vrot.slane %v445_v52, %v2593_v14 }
  0xa3   : > { %v323_v53 = vpop.permute.xlu0 %322  ;;  %v332_v54 = vpop.permute.xlu1 %331 }
  0xa4   : > { %v428_v56 = vcombine.high %v418_v50, %v426_v51  ;;  %v453_v57 = vcombine.low %v287_v38, %v323_v53  ;;  %v427_v59 = vcombine.low %v418_v50, %v426_v51  ;;  %v2635_v62 = vrot.slane %v332_v54, %v2593_v14 }
  0xa6   : > { %v2631_v60 = vrot.slane %v428_v56, %v2598_v22  ;;  %v460_v61 = vrot.slane %v453_v57, %v2593_v14  ;;  %v435_v7 = vrot.slane %v427_v59, %v2598_v22  ;;  %v494_v9 = vrot.slane %v2635_v62, %v2598_v22 }
  0xa7   : > { %v338_v0 = vpop.permute.xlu0 %337  ;;  %v2638_v2 = vpop.permute.xlu1 %198 }
  0xa8   : > { %v461_v5 = vcombine.low %v452_v63, %v460_v61  ;;  %v462_v6 = vcombine.high %v452_v63, %v460_v61  ;;  %v444_v8 = vcombine.high %v2631_v60, %v3582_v34  ;;  %v2650_v10 = vrot.slane %v338_v0, %v2593_v14 }
  0xa9   : > { %v443_v26 = vcombine.high %v435_v7, %v3582_v34  ;;  %v502_v30 = vcombine.high %v494_v9, %v3582_v34  ;;  %v922_v43 = vshrl.u32 %v494_v9, 16  ;;  %v868_v45 = vshrl.u32 %v435_v7, 16 }
  0xaa   : > { %v469_v12 = vrot.slane %v461_v5, %v2598_v22  ;;  %v2655_v13 = vrot.slane %v462_v6, %v2598_v22  ;;  %v519_v20 = vrot.slane %v2650_v10, %v2598_v22  ;;  %v886_v27 = vshrl.u32 %v444_v8, 16 }
  0xab   : > { %v2657_v15 = vpop.permute.xlu0 %207  ;;  %v2659_v16 = vpop.permute.xlu1 %216  ;;  %v874_v48 = vshrl.u32 %v443_v26, 16  ;;  %v928_v53 = vshrl.u32 %v502_v30, 16  ;;  %v822_v0 = vpack.i.b16 %v821_v44, %v820_v17 }
  0xac   : > { %v477_v24 = vcombine.high %v469_v12, %v3582_v34  ;;  %v478_v25 = vcombine.high %v2655_v13, %v3582_v34  ;;  %v879_v28 = vpack.i.b16 %v2655_v13, %v2631_v60  ;;  %v869_v31 = vshrl.u32 %v469_v12, 16 }
  0xad   : > { %v527_v35 = vcombine.high %v519_v20, %v3582_v34  ;;  %v867_v50 = vpack.i.b16 %v469_v12, %v435_v7  ;;  %v921_v51 = vpack.i.b16 %v519_v20, %v494_v9  ;;  %v923_v52 = vshrl.u32 %v519_v20, 16 }
  0xae   : > { %v885_v32 = vpack.i.b16 %v478_v25, %v444_v8  ;;  %v887_v33 = vshrl.u32 %v478_v25, 16  ;;  %v873_v39 = vpack.i.b16 %v477_v24, %v443_v26  ;;  %v875_v40 = vshrl.u32 %v477_v24, 16 }
  0xaf   : > { %v226_v37 = vpop.permute.xlu0 %225  ;;  %v235_v38 = vpop.permute.xlu1 %234  ;;  %v2676_v41 = vcombine.low %v825_v23, %v879_v28  ;;  %v929_v54 = vshrl.u32 %v527_v35, 16  ;;  %v870_v56 = vpack.i.b16 %v869_v31, %v868_v45  ;;  %v924_v63 = vpack.i.b16 %v923_v52, %v922_v43 }
  0xb0   : > { %v2678_v46 = vpack.i.b16 %v887_v33, %v886_v27  ;;  %v2680_v47 = vcombine.low %v831_v42, %v885_v32  ;;  %v876_v59 = vpack.i.b16 %v875_v40, %v874_v48  ;;  %v2684_v61 = vcombine.low %v819_v21, %v873_v39 }
  0xb1   : > { %1368 = vrot.lane.b32.xlu0 %v2676_v41, %s2446_s10  ;;  %v927_v42 = vpack.i.b16 %v527_v35, %v502_v30  ;;  %v2686_v3 = vcombine.low %v816_v55, %v870_v56  ;;  %v2690_v4 = vcombine.low %v813_v18, %v867_v50  ;;  %v2692_v5 = vcombine.low %v921_v51, %v921_v51 }
  0xb2   : > { %3588 = vst [vmem:[#allocation2_spill] sm:$0xff] %v2680_v47  ;;  %v2238_v6 = vcombine.low %v924_v63, %v924_v63  ;;  %v529_v7 = vcombine.low %v2537_v1, %v226_v37  ;;  %v930_v8 = vpack.i.b16 %v929_v54, %v928_v53  ;;  %v2701_v12 = vcombine.low %v822_v0, %v876_v59 }
  0xb3   : > { %v244_v57 = vpop.permute.xlu0 %243  ;;  %v253_v58 = vpop.permute.xlu1 %252  ;;  %1362 = vrot.lane.b32.xlu1 %v2686_v3, %s2446_s10  ;;  %v1282_v17 = vrot.slane %v2686_v3, 1  ;;  %v2704_v19 = vcombine.low %v927_v42, %v927_v42  ;;  %v563_v1 = vcombine.low %v2638_v2, %v235_v38  ;;  %v1279_v23 = vrot.slane %v2690_v4, 1 }
  0xb4   : > { %v1283_v18 = vrot.slane %v2238_v6, 1  ;;  %v2707_v20 = vrot.slane %v529_v7, %v2593_v14  ;;  %v537_v21 = vcombine.low %v2657_v15, %v244_v57  ;;  %v1280_v24 = vrot.slane %v2692_v5, 1 }
  0xb5   : > { %1364 = vrot.lane.b32.xlu0 %v2684_v61, %s2446_s10  ;;  %v2717_v25 = vcombine.low %v930_v8, %v930_v8  ;;  %v1069_v15 = vshll.u32 %v2686_v3, 16  ;;  %v2726_v27 = vrot.slane %v563_v1, %v2593_v14  ;;  %v571_v28 = vcombine.low %v2659_v16, %v253_v58 }
  0xb6   : > { %v2720_v26 = vrot.slane %v537_v21, %v2593_v14  ;;  %v1284_v31 = vsel %vm1278_vm0, %v1282_v17, %v1283_v18  ;;  %v1285_v32 = vrot.slane %v2684_v61, 1  ;;  %v1286_v33 = vrot.slane %v2704_v19, 1 }
  0xb7   : > { %v2697_v9 = vpop.permute.xlu0 %261  ;;  %v2699_v11 = vpop.permute.xlu1 %270  ;;  %1478 = vrot.lane.b32.xlu1 %v2684_v61, %s2447_s11  ;;  %v1281_v37 = vsel %vm1278_vm0, %v1279_v23, %v1280_v24  ;;  %v2739_v38 = vrot.slane %v571_v28, %v2593_v14  ;;  %v1288_v16 = vrot.slane %v2701_v12, 1  ;;  %v1289_v39 = vrot.slane %v2717_v25, 1  ;;  %v2398_v28 = vld [vmem:[%s3579_s1] sm:$0xff]  }
  0xb8   : > { %v546_v35 = vcombine.high %v2707_v20, %v2720_v26  ;;  %v1071_v43 = vrot.slane %v1069_v15, 1  ;;  %v1074_v44 = vshll.u32 %v2238_v6, 16  ;;  %v2750_v48 = vsel %vm1278_vm0, %v1285_v32, %v1286_v33  ;;  %2298 = vmatprep.subr.bf16.mxu0 %v2398_v28  ;;  %2336 = vmatprep.subr.bf16.mxu1 %v2398_v28 }
  0xb9   : > { %1480 = vrot.lane.b32.xlu0 %v2701_v12, %s2447_s11  ;;  %v580_v45 = vcombine.high %v2726_v27, %v2739_v38  ;;  %v1081_v51 = vshll.u32 %v2684_v61, 16  ;;  %v487_v53 = vcombine.high %v2635_v62, %v3582_v34  ;;  %v1067_v54 = vshrl.u32 %v2686_v3, 16  ;;  %2299 = vmatpush3.bf16.msra.mxu0 %v2398_v28 }
  0xba   : > { %v2745_v40 = vrot.slane %v546_v35, %v2598_v22  ;;  %v512_v57 = vcombine.high %v2650_v10, %v3582_v34  ;;  %v2770_v58 = vsel %vm1278_vm0, %v1288_v16, %v1289_v39  ;;  %v1076_v63 = vrot.slane %v1074_v44, 1  ;;  %2339 = vmatpush3.bf16.msra.mxu1 %v2398_v28 }
  0xbb   : > { %v2722_v2 = vpop.permute.xlu0 %279  ;;  %v2729_v30 = vpop.permute.xlu1 %288  ;;  %1327 = vrot.lane.b32.xlu1 %v1281_v37, %s2448_s16  ;;  %v2763_v55 = vrot.slane %v580_v45, %v2598_v22  ;;  %v1072_v59 = vor.u32 %v1071_v43, %v1067_v54  ;;  %v1086_v42 = vshll.u32 %v2704_v19, 16  ;;  %v1083_v7 = vrot.slane %v1081_v51, 1 }
  0xbc   : > { %v2754_v50 = vcombine.high %v2745_v40, %v3582_v34  ;;  %v850_v62 = vshrl.u32 %v2745_v40, 16  ;;  %v2783_v17 = vrot.slane %v487_v53, %v2598_v22  ;;  %v1057_v18 = vshll.u32 %v2690_v4, 16 }
  0xbd   : > { %1329 = vrot.lane.b32.xlu0 %v1284_v31, %s2448_s16  ;;  %v2776_v0 = vcombine.high %v2763_v55, %v3582_v34  ;;  %v849_v10 = vpack.i.b16 %v2763_v55, %v2745_v40  ;;  %v851_v8 = vshrl.u32 %v2763_v55, 16  ;;  %v2791_v1 = vrot.slane %v512_v57, %v2598_v22 }
  0xbe   : > { %v856_v6 = vshrl.u32 %v2754_v50, 16  ;;  %v1079_v21 = vshrl.u32 %v2684_v61, 16  ;;  %v1093_v32 = vshll.u32 %v2701_v12, 16  ;;  %v2806_v16 = vsel %vm1053_vm1, %v1072_v59, %v1076_v63 }
  0xbf   : > { %v298_v52 = vpop.permute.xlu0 %297  ;;  %v307_v56 = vpop.permute.xlu1 %306  ;;  %1366 = vrot.lane.b32.xlu1 %v2701_v12, %s2446_s10  ;;  %v855_v19 = vpack.i.b16 %v2776_v0, %v2754_v50  ;;  %v2795_v23 = vpack.i.b16 %v851_v8, %v850_v62  ;;  %v857_v24 = vshrl.u32 %v2776_v0, 16  ;;  %v1088_v43 = vrot.slane %v1086_v42, 1 }
  0xc0   : > { %v597_v33 = vcombine.low %v2697_v9, %v298_v52  ;;  %v631_v35 = vcombine.low %v2699_v11, %v307_v56  ;;  %v1084_v39 = vor.u32 %v1083_v7, %v1079_v21  ;;  %v1059_v45 = vrot.slane %v1057_v18, 1 }
  0xc1   : > { %1445 = vrot.lane.b32.xlu0 %v2750_v48, %s2449_s17  ;;  %v2808_v44 = vpack.i.b16 %v857_v24, %v856_v6  ;;  %v1062_v9 = vshll.u32 %v2692_v5, 16  ;;  %v2399_v5 = vld [vmem:[%s3579_s1 + $0x8] sm:$0xff]   ;;  %v1055_v53 = vshrl.u32 %v2690_v4, 16  ;;  %v1095_v54 = vrot.slane %v1093_v32, 1 }
  0xc2   : > { %v2814_v11 = vrot.slane %v597_v33, %v2593_v14  ;;  %v2822_v51 = vrot.slane %v631_v35, %v2593_v14  ;;  %v1089_v57 = vsel %vm1053_vm1, %v1084_v39, %v1088_v43  ;;  %v1098_v62 = vshll.u32 %v2717_v25, 16  ;;  %2300 = vmatprep.subr.bf16.mxu0 %v2399_v5  ;;  %2337 = vmatprep.subr.bf16.mxu1 %v2399_v5 }
  0xc3   : > { %1443 = vrot.lane.b32.xlu1 %v1284_v31, %s2449_s17  ;;  %v316_v15 = vpop.permute.xlu0 %315  ;;  %v325_v31 = vpop.permute.xlu1 %324  ;;  %v933_v59 = vpack.i.b16 %v2791_v1, %v2783_v17  ;;  %v1060_v63 = vor.u32 %v1059_v45, %v1055_v53  ;;  %v1064_v42 = vrot.slane %v1062_v9, 1  ;;  %v1091_v6 = vshrl.u32 %v2701_v12, 16  ;;  %2301 = vmatpush3.bf16.msra.mxu0 %v2399_v5 }
  0xc4   : > { %v605_v37 = vcombine.low %v2722_v2, %v316_v15  ;;  %v639_v52 = vcombine.low %v2729_v30, %v325_v31  ;;  %v881_v25 = vshrl.u32 %v2655_v13, 16  ;;  %2340 = vmatpush3.bf16.msra.mxu1 %v2399_v5  ;;  %v880_v18 = vshrl.u32 %v2631_v60, 16 }
  0xc5   : > { %1333 = vrot.lane.b32.xlu0 %v2770_v58, %s2448_s16  ;;  %v1096_v21 = vor.u32 %v1095_v54, %v1091_v6  ;;  %v1100_v15 = vrot.slane %v1098_v62, 1  ;;  %v2241_v28 = vcombine.low %v933_v59, %v933_v59  ;;  %v1105_v32 = vshll.u32 %v2676_v41, 16 }
  0xc6   : > { %v2817_v2 = vrot.slane %v605_v37, %v2593_v14  ;;  %v2836_v30 = vrot.slane %v639_v52, %v2593_v14  ;;  %v826_v13 = vshrl.u32 %v2602_v29, 16  ;;  %v1065_v35 = vsel %vm1053_vm1, %v1060_v63, %v1064_v42 }
  0xc7   : > { %1559 = vrot.lane.b32.xlu1 %v2750_v48, %s2451_s22  ;;  %v827_v37 = vshrl.u32 %v2610_v36, 16  ;;  %v882_v31 = vpack.i.b16 %v881_v25, %v880_v18  ;;  %v934_v60 = vshrl.u32 %v2783_v17, 16  ;;  %v935_v43 = vshrl.u32 %v2791_v1, 16 }
  0xc8   : > { %v614_v56 = vcombine.high %v2814_v11, %v2817_v2  ;;  %v648_v8 = vcombine.high %v2822_v51, %v2836_v30  ;;  %v1101_v29 = vsel %vm1053_vm1, %v1096_v21, %v1100_v15  ;;  %v1107_v5 = vrot.slane %v1105_v32, 1 }
  0xc9   : > { %1248 = vrot.lane.b32.xlu0 %v2806_v16, %s2450_s21  ;;  %v1110_v53 = vshll.u32 %v2241_v28, 16  ;;  %v828_v59 = vpack.i.b16 %v827_v37, %v826_v13  ;;  %v1103_v63 = vshrl.u32 %v2676_v41, 16  ;;  %v1292_v50 = vrot.slane %v2241_v28, 1 }
  0xca   : > { %v628_v7 = vrot.slane %v614_v56, %v2598_v22  ;;  %v662_v33 = vrot.slane %v648_v8, %v2598_v22  ;;  %v2894_v32 = vcombine.low %v2620_v49, %v2678_v46  ;;  %v334_v49 = vpop.permute.xlu0 %333 }
  0xcb   : > { %1331 = vrot.lane.b32.xlu1 %v2750_v48, %s2448_s16  ;;  %v2878_v25 = vcombine.low %v828_v59, %v882_v31  ;;  %v1108_v40 = vor.u32 %v1107_v5, %v1103_v63  ;;  %v1112_v55 = vrot.slane %v1110_v53, 1 }
  0xcc   : > { %v630_v24 = vcombine.high %v628_v7, %v3582_v34  ;;  %v904_v48 = vshrl.u32 %v628_v7, 16  ;;  %v664_v39 = vcombine.high %v662_v33, %v3582_v34  ;;  %v903_v9 = vpack.i.b16 %v662_v33, %v628_v7  ;;  %3589 = vst [vmem:[#allocation3_spill] sm:$0xff] %v2894_v32 }
  0xcd   : > { %1410 = vrot.lane.b32.xlu0 %v1089_v57, %s2452_s25  ;;  %v905_v52 = vshrl.u32 %v662_v33, 16  ;;  %v1113_v8 = vsel %vm1053_vm1, %v1108_v40, %v1112_v55  ;;  %v528_v33 = vcombine.high %v2791_v1, %v3582_v34  ;;  %v1294_v1 = vrot.slane %v2878_v25, 1 }
  0xce   : > { %v910_v45 = vshrl.u32 %v630_v24, 16  ;;  %v909_v54 = vpack.i.b16 %v664_v39, %v630_v24  ;;  %v911_v56 = vshrl.u32 %v664_v39, 16  ;;  %v2863_v62 = vcombine.low %v849_v10, %v903_v9 }
  0xcf   : > { %1246 = vrot.lane.b32.xlu1 %v1065_v35, %s2450_s21  ;;  %v906_v36 = vpack.i.b16 %v905_v52, %v904_v48  ;;  %v936_v10 = vpack.i.b16 %v935_v43, %v934_v60  ;;  %v2911_v48 = vpop.permute.xlu0 %200  ;;  %v941_v43 = vshrl.u32 %v528_v33, 16  ;;  %v1127_v9 = vshrl.u32 %v2680_v47, 16 }
  0xd0   : > { %v2871_v42 = vcombine.low %v855_v19, %v909_v54  ;;  %v2873_v6 = vpack.i.b16 %v911_v56, %v910_v45  ;;  %v1117_v19 = vshll.u32 %v2878_v25, 16  ;;  %v340_v45 = vpop.permute.xlu1 %339  ;;  %v1141_v55 = vshll.u32 %v2894_v32, 16 }
  0xd1   : > { %1250 = vrot.lane.b32.xlu0 %v1089_v57, %s2450_s21  ;;  %v2876_v7 = vcombine.low %v2795_v23, %v906_v36  ;;  %v2242_v0 = vcombine.low %v936_v10, %v936_v10  ;;  %v1291_v23 = vrot.slane %v2676_v41, 1 }
  0xd2   : > { %v1119_v21 = vrot.slane %v1117_v19, 1  ;;  %v613_v19 = vcombine.low %v2814_v11, %v2817_v2 }
  0xd3   : > { %1561 = vrot.lane.b32.xlu1 %v2770_v58, %s2451_s22  ;;  %v1293_v18 = vsel %vm1278_vm0, %v1291_v23, %v1292_v50  ;;  %v1122_v24 = vshll.u32 %v2242_v0, 16  ;;  %v2920_v52 = vpop.permute.xlu0 %218  ;;  %v545_v50 = vcombine.low %v2707_v20, %v2720_v26  ;;  %v647_v23 = vcombine.low %v2822_v51, %v2836_v30 }
  0xd4   : > { %v2928_v56 = vpop.permute.xlu1 %209  ;;  %v1139_v20 = vshrl.u32 %v2894_v32, 16 }
  0xd5   : > { %1526 = vrot.lane.b32.xlu0 %v1101_v29, %s2453_s26  ;;  %v1124_v28 = vrot.slane %v1122_v24, 1  ;;  %v2956_v26 = vrot.slane %v545_v50, %v2598_v22  ;;  %v2967_v2 = vrot.slane %v647_v23, %v2598_v22 }
  0xd7   : > { %1408 = vrot.lane.b32.xlu1 %v2806_v16, %s2452_s25  ;;  %v1115_v16 = vshrl.u32 %v2878_v25, 16  ;;  %v2934_v10 = vpop.permute.xlu0 %236 }
  0xd9   : > { %1252 = vrot.lane.b32.xlu0 %v1101_v29, %s2450_s21  ;;  %v1120_v15 = vor.u32 %v1119_v21, %v1115_v16  ;;  %v1143_v21 = vrot.slane %v1141_v55, 1  ;;  %v2951_v16 = vpop.permute.xlu1 %227 }
  0xdb   : > { %1524 = vrot.lane.b32.xlu1 %v1089_v57, %s2453_s26  ;;  %v503_v57 = vcombine.high %v2783_v17, %v3582_v34  ;;  %v1125_v13 = vsel %vm1053_vm1, %v1120_v15, %v1124_v28  ;;  %v1129_v17 = vshll.u32 %v2680_v47, 16  ;;  %v2964_v11 = vpop.permute.xlu0 %254  ;;  %v1144_v51 = vor.u32 %v1143_v21, %v1139_v20 }
  0xdc   : > { %v2971_v15 = vcombine.low %v2808_v44, %v2873_v6  ;;  %v2976_v28 = vrot.slane %v334_v49, %v2593_v14 }
  0xdd   : > { %1414 = vrot.lane.b32.xlu0 %v1113_v8, %s2452_s25  ;;  %v939_v46 = vpack.i.b16 %v528_v33, %v503_v57  ;;  %v1131_v31 = vrot.slane %v1129_v17, 1  ;;  %v940_v39 = vshrl.u32 %v503_v57, 16  ;;  %v2979_v57 = vrot.slane %v340_v45, %v2593_v14  ;;  %v2994_v49 = vpop.permute.xlu1 %245 }
  0xde   : > { %v2988_v44 = vrot.slane %v2976_v28, %v2598_v22 }
  0xdf   : > { %1412 = vrot.lane.b32.xlu1 %v1101_v29, %s2452_s25  ;;  %v2243_v35 = vcombine.low %v939_v46, %v939_v46  ;;  %v2400_v29 = vld [vmem:[%s3579_s1 + $0x10] ss:$0 sps:$4 sm:$0x33]   ;;  %v1132_v5 = vor.u32 %v1131_v31, %v1127_v9  ;;  %v942_v54 = vpack.i.b16 %v941_v43, %v940_v39  ;;  %v2992_v6 = vrot.slane %v2979_v57, %v2598_v22 }
  0xe0   : > { %2342 = vmatprep.subr.msk.bf16.mxu0 %vm1915_vm2, %v2400_v29  ;;  %v1917_v36 = vsel %vm1915_vm2, %v2400_v29, 0  ;;  %2343 = vmatprep.subr.msk.bf16.mxu1 %vm1915_vm2, %v2400_v29  ;;  %v893_v39 = vshrl.u32 %v2967_v2, 16 }
  0xe1   : > { %1449 = vrot.lane.b32.xlu0 %v1293_v18, %s2449_s17  ;;  %v1134_v60 = vshll.u32 %v2243_v35, 16  ;;  %v1298_v63 = vrot.slane %v2243_v35, 1  ;;  %v2931_v40 = vcombine.low %v942_v54, %v942_v54  ;;  %2303 = vmatpush3.bf16.msra.mxu0 %v1917_v36  ;;  %v945_v17 = vpack.i.b16 %v2992_v6, %v2988_v44 }
  0xe2   : > { %2341 = vmatpush3.bf16.msra.mxu1 %v1917_v36  ;;  %v946_v36 = vshrl.u32 %v2988_v44, 16 }
  0xe3   : > { %1447 = vrot.lane.b32.xlu1 %v2770_v58, %s2449_s17  ;;  %v1295_v58 = vrot.slane %v2242_v0, 1  ;;  %v1136_v53 = vrot.slane %v1134_v60, 1  ;;  %v579_v0 = vcombine.low %v2726_v27, %v2739_v38  ;;  %v1146_v24 = vshll.u32 %v2931_v40, 16 }
  0xe4   : > { %v2962_v38 = vrot.slane %v613_v19, %v2598_v22  ;;  %v2245_v45 = vcombine.low %v945_v17, %v945_v17  ;;  %v1301_v9 = vrot.slane %v2931_v40, 1 }
  0xe5   : > { %1484 = vrot.lane.b32.xlu0 %v2878_v25, %s2447_s11  ;;  %v1296_v37 = vsel %vm1278_vm0, %v1294_v1, %v1295_v58  ;;  %v1137_v59 = vsel %vm1053_vm1, %v1132_v5, %v1136_v53  ;;  %v2959_v27 = vrot.slane %v579_v0, %v2598_v22  ;;  %v1148_v30 = vrot.slane %v1146_v24, 1  ;;  %v2997_v58 = vpop.permute.xlu0 %272  ;;  %v3007_v1 = vpop.permute.xlu1 %263 }
  0xe6   : > { %v892_v60 = vshrl.u32 %v2962_v38, 16  ;;  %v1300_v5 = vrot.slane %v2894_v32, 1  ;;  %v1158_v50 = vshll.u32 %v2245_v45, 16 }
  0xe7   : > { %1482 = vrot.lane.b32.xlu1 %v2676_v41, %s2447_s11  ;;  %v837_v33 = vpack.i.b16 %v2959_v27, %v2956_v26  ;;  %v1149_v46 = vsel %vm1053_vm1, %v1144_v51, %v1148_v30  ;;  %v839_v31 = vshrl.u32 %v2959_v27, 16 }
  0xe8   : > { %v894_v54 = vpack.i.b16 %v893_v39, %v892_v60  ;;  %v1302_v55 = vsel %vm1278_vm0, %v1300_v5, %v1301_v9  ;;  %v1160_v24 = vrot.slane %v1158_v50, 1  ;;  %v595_v5 = vcombine.high %v2959_v27, %v3582_v34 }
  0xe9   : > { %1530 = vrot.lane.b32.xlu0 %v1125_v13, %s2453_s26  ;;  %v3014_v43 = vpop.permute.xlu0 %290  ;;  %v688_v50 = vcombine.high %v2988_v44, %v3582_v34 }
  0xeb   : > { %1528 = vrot.lane.b32.xlu1 %v1113_v8, %s2453_s26 }
  0xed   : > { %1254 = vrot.lane.b32.xlu0 %v1113_v8, %s2450_s21  ;;  %v1297_v8 = vrot.slane %v2680_v47, 1  ;;  %v3027_v0 = vpop.permute.xlu0 %308 }
  0xef   : > { %1563 = vrot.lane.b32.xlu1 %v1293_v18, %s2451_s22 }
  0xf1   : > { %1256 = vrot.lane.b32.xlu0 %v1125_v13, %s2450_s21  ;;  %v3038_v51 = vpop.permute.xlu0 %326 }
  0xf3   : > { %1565 = vrot.lane.b32.xlu1 %v1296_v37, %s2451_s22 }
  0xf5   : > { %1337 = vrot.lane.b32.xlu0 %v1296_v37, %s2448_s16 }
  0xf7   : > { %1335 = vrot.lane.b32.xlu1 %v1293_v18, %s2448_s16  ;;  %v1299_v18 = vsel %vm1278_vm0, %v1297_v8, %v1298_v63  ;;  %v3023_v63 = vpop.permute.xlu1 %281 }
  0xf9   : > { %1372 = vrot.lane.b32.xlu0 %v2680_v47, %s2446_s10 }
  0xfb   : > { %1370 = vrot.lane.b32.xlu1 %v2878_v25, %s2446_s10  ;;  %v3035_v20 = vpop.permute.xlu1 %299 }
  0xfd   : > { %1418 = vrot.lane.b32.xlu0 %v1137_v59, %s2452_s25 }
  0xff   : > { %1416 = vrot.lane.b32.xlu1 %v1125_v13, %s2452_s25  ;;  %v891_v13 = vpack.i.b16 %v2967_v2, %v2962_v38  ;;  %v3048_v60 = vpop.permute.xlu1 %317 }
 0x101   : > { %1453 = vrot.lane.b32.xlu0 %v1299_v18, %s2449_s17  ;;  %v3002_v35 = vcombine.low %v837_v33, %v891_v13  ;;  %v1304_v13 = vrot.slane %v2245_v45, 1  ;;  %v561_v45 = vcombine.high %v2956_v26, %v3582_v34 }
 0x103   : > { %1451 = vrot.lane.b32.xlu1 %v1296_v37, %s2449_s17  ;;  %3590 = vst [vmem:[#allocation4_spill] sm:$0xff] %v3002_v35  ;;  %v838_v37 = vshrl.u32 %v2956_v26, 16  ;;  %v1153_v29 = vshll.u32 %v3002_v35, 16  ;;  %v1151_v40 = vshrl.u32 %v3002_v35, 16  ;;  %v1303_v30 = vrot.slane %v3002_v35, 1 }
 0x104   : > { %v843_v26 = vpack.i.b16 %v595_v5, %v561_v45  ;;  %v844_v44 = vshrl.u32 %v561_v45, 16 }
 0x105   : > { %1488 = vrot.lane.b32.xlu0 %v2894_v32, %s2447_s11  ;;  %v840_v53 = vpack.i.b16 %v839_v31, %v838_v37  ;;  %v1155_v8 = vrot.slane %v1153_v29, 1  ;;  %v3046_v31 = vpop.permute.xlu0 %341 }
 0x106   : > { %3591 = vst [vmem:[#allocation5_spill] sm:$0xff] %v3046_v31 }
 0x107   : > { %1486 = vrot.lane.b32.xlu1 %v2680_v47, %s2447_s11  ;;  %v3031_v19 = vcombine.low %v840_v53, %v894_v54  ;;  %v1156_v21 = vor.u32 %v1155_v8, %v1151_v40  ;;  %v629_v54 = vcombine.high %v2962_v38, %v3582_v34  ;;  %v713_v38 = vcombine.high %v2992_v6, %v3582_v34 }
 0x109   : > { %1534 = vrot.lane.b32.xlu0 %v1149_v46, %s2453_s26  ;;  %v1161_v33 = vsel %vm1053_vm1, %v1156_v21, %v1160_v24  ;;  %v1165_v37 = vshll.u32 %v3031_v19, 16  ;;  %v1163_v39 = vshrl.u32 %v3031_v19, 16  ;;  %v951_v24 = vpack.i.b16 %v713_v38, %v688_v50 }
 0x10a   : > { %v953_v45 = vshrl.u32 %v713_v38, 16 }
 0x10b   : > { %1532 = vrot.lane.b32.xlu1 %v1137_v59, %s2453_s26  ;;  %v1167_v9 = vrot.slane %v1165_v37, 1 }
 0x10d   : > { %1258 = vrot.lane.b32.xlu0 %v1137_v59, %s2450_s21  ;;  %v947_v59 = vshrl.u32 %v2992_v6, 16  ;;  %v1168_v40 = vor.u32 %v1167_v9, %v1163_v39  ;;  %v845_v6 = vshrl.u32 %v595_v5, 16 }
 0x10f   : > { %1567 = vrot.lane.b32.xlu1 %v1299_v18, %s2451_s22  ;;  %v948_v23 = vpack.i.b16 %v947_v59, %v946_v36  ;;  %v663_v36 = vcombine.high %v2967_v2, %v3582_v34  ;;  %v3064_v59 = vpop.permute.xlu1 %335 }
 0x111   : > { %1260 = vrot.lane.b32.xlu0 %v1149_v46, %s2450_s21  ;;  %v2246_v17 = vcombine.low %v948_v23, %v948_v23  ;;  %v897_v27 = vpack.i.b16 %v663_v36, %v629_v54  ;;  %v899_v37 = vshrl.u32 %v663_v36, 16 }
 0x113   : > { %1569 = vrot.lane.b32.xlu1 %v1302_v55, %s2451_s22  ;;  %v1170_v29 = vshll.u32 %v2246_v17, 16  ;;  %v3083_v21 = vcombine.low %v843_v26, %v897_v27  ;;  %v846_v27 = vpack.i.b16 %v845_v6, %v844_v44 }
 0x115   : > { %1341 = vrot.lane.b32.xlu0 %v1302_v55, %s2448_s16  ;;  %v1172_v8 = vrot.slane %v1170_v29, 1  ;;  %v1306_v29 = vrot.slane %v3031_v19, 1  ;;  %v1177_v26 = vshll.u32 %v3083_v21, 16 }
 0x117   : > { %1339 = vrot.lane.b32.xlu1 %v1299_v18, %s2448_s16  ;;  %v1305_v18 = vsel %vm1278_vm0, %v1303_v30, %v1304_v13  ;;  %v1173_v23 = vsel %vm1053_vm1, %v1168_v40, %v1172_v8  ;;  %v898_v13 = vshrl.u32 %v629_v54, 16  ;;  %v1307_v40 = vrot.slane %v2246_v17, 1 }
 0x118   : > { %v2247_v8 = vcombine.low %v951_v24, %v951_v24 }
 0x119   : > { %1376 = vrot.lane.b32.xlu0 %v3002_v35, %s2446_s10  ;;  %v900_v34 = vpack.i.b16 %v899_v37, %v898_v13  ;;  %v1308_v36 = vsel %vm1278_vm0, %v1306_v29, %v1307_v40  ;;  %v1309_v37 = vrot.slane %v3083_v21, 1 }
 0x11a   : > { %v1182_v17 = vshll.u32 %v2247_v8, 16  ;;  %v1310_v29 = vrot.slane %v2247_v8, 1 }
 0x11b   : > { %1374 = vrot.lane.b32.xlu1 %v2894_v32, %s2446_s10  ;;  %v1179_v32 = vrot.slane %v1177_v26, 1 }
 0x11c   : > { %v1184_v6 = vrot.slane %v1182_v17, 1 }
 0x11d   : > { %1422 = vrot.lane.b32.xlu0 %v1161_v33, %s2452_s25 }
 0x11f   : > { %1420 = vrot.lane.b32.xlu1 %v1149_v46, %s2452_s25 }
 0x121   : > { %1457 = vrot.lane.b32.xlu0 %v1305_v18, %s2449_s17 }
 0x123   : > { %v3058_v53 = vpop.permute.xlu0 %1368  ;;  %1455 = vrot.lane.b32.xlu1 %v1302_v55, %s2449_s17 }
 0x125   : > { %1492 = vrot.lane.b32.xlu0 %v3031_v19, %s2447_s11  ;;  %v3075_v2 = vpop.permute.xlu1 %1362 }
 0x127   : > { %v3069_v46 = vpop.permute.xlu0 %1364  ;;  %1490 = vrot.lane.b32.xlu1 %v3002_v35, %s2447_s11  ;;  %v1175_v35 = vshrl.u32 %v3083_v21, 16 }
 0x129   : > { %1538 = vrot.lane.b32.xlu0 %v1173_v23, %s2453_s26  ;;  %v3085_v30 = vpop.permute.xlu1 %1478  ;;  %v1180_v44 = vor.u32 %v1179_v32, %v1175_v35  ;;  %v3119_v35 = vsel %vm1278_vm0, %v1309_v37, %v1310_v29 }
 0x12b   : > { %v3081_v55 = vpop.permute.xlu0 %1480  ;;  %1536 = vrot.lane.b32.xlu1 %v1161_v33, %s2453_s26  ;;  %v1185_v26 = vsel %vm1053_vm1, %v1180_v44, %v1184_v6  ;;  %v3592_v6 = vmov 0  }
 0x12d   : > { %1262 = vrot.lane.b32.xlu0 %v1161_v33, %s2450_s21  ;;  %v3089_v9 = vpop.permute.xlu1 %1327  ;;  %v952_v33 = vshrl.u32 %v688_v50, 16  ;;  %v3103_v50 = vcombine.low %v846_v27, %v900_v34 }
 0x12f   : > { %v1330_v39 = vpop.permute.xlu0 %1329  ;;  %1571 = vrot.lane.b32.xlu1 %v1305_v18, %s2451_s22  ;;  %v954_v38 = vpack.i.b16 %v953_v45, %v952_v33  ;;  %v1189_v32 = vshll.u32 %v3103_v50, 16  ;;  %v1187_v27 = vshrl.u32 %v3103_v50, 16 }
 0x131   : > { %1264 = vrot.lane.b32.xlu0 %v1173_v23, %s2450_s21  ;;  %v3095_v54 = vpop.permute.xlu1 %1366  ;;  %v3112_v31 = vcombine.low %v954_v38, %v954_v38  ;;  %v1191_v33 = vrot.slane %v1189_v32, 1  ;;  %v698_v38 = vcombine.high %v2979_v57, %v3592_v6 }
 0x133   : > { %v1446_v5 = vpop.permute.xlu0 %1445  ;;  %1573 = vrot.lane.b32.xlu1 %v1308_v36, %s2451_s22  ;;  %v1194_v45 = vshll.u32 %v3112_v31, 16  ;;  %v1192_v37 = vor.u32 %v1191_v33, %v1187_v27  ;;  %v3148_v57 = vrot.slane %v698_v38, %v2598_v22 }
 0x135   : > { %1345 = vrot.lane.b32.xlu0 %v1308_v36, %s2448_s16  ;;  %v1444_v47 = vpop.permute.xlu1 %1443  ;;  %v1196_v29 = vrot.slane %v1194_v45, 1 }
 0x137   : > { %v3101_v24 = vpop.permute.xlu0 %1333  ;;  %1343 = vrot.lane.b32.xlu1 %v1305_v18, %s2448_s16  ;;  %v3151_v27 = vsel %vm1053_vm1, %v1192_v37, %v1196_v29 }
 0x139   : > { %1380 = vrot.lane.b32.xlu0 %v3083_v21, %s2446_s10  ;;  %v3109_v40 = vpop.permute.xlu1 %1559 }
 0x13b   : > { %v1249_v13 = vpop.permute.xlu0 %1248  ;;  %1378 = vrot.lane.b32.xlu1 %v3031_v19, %s2446_s10 }
 0x13c   : > { %v1595_v18 = vsel %vm1591_vm3, %v2686_v3, %v1249_v13  ;;  %v673_v3 = vcombine.high %v2976_v28, %v3592_v6 }
 0x13d   : > { %1426 = vrot.lane.b32.xlu0 %v1185_v26, %s2452_s25  ;;  %v3123_v8 = vpop.permute.xlu1 %1331  ;;  %v1628_v17 = vsel %vm1624_vm4, %v1595_v18, %v1330_v39 }
 0x13e   : > { %v3145_v28 = vrot.slane %v673_v3, %v2598_v22 }
 0x13f   : > { %v1411_v34 = vpop.permute.xlu0 %1410  ;;  %1424 = vrot.lane.b32.xlu1 %v1173_v23, %s2452_s25  ;;  %v1661_v23 = vsel %vm1657_vm5, %v1628_v17, %v3069_v46 }
 0x140   : > { %v1694_v46 = vsel %vm1690_vm6, %v1661_v23, %v1411_v34  ;;  %v1313_v23 = vrot.slane %v3112_v31, 1 }
 0x141   : > { %1461 = vrot.lane.b32.xlu0 %v3119_v35, %s2449_s17  ;;  %v1247_v13 = vpop.permute.xlu1 %1246  ;;  %v1727_v45 = vsel %vm1723_vm7, %v1694_v46, %v1446_v5 }
 0x142   : > { %v1593_v39 = vsel %vm1591_vm3, %v2690_v4, %v1247_v13  ;;  %v1760_v38 = vsel %vm1756_vm8, %v1727_v45, %v3081_v55  ;;  %v1199_v45 = vshrl.u32 %v2863_v62, 16 }
 0x143   : > { %v3131_v44 = vpop.permute.xlu0 %1250  ;;  %1459 = vrot.lane.b32.xlu1 %v1308_v36, %s2449_s17  ;;  %v1626_v33 = vsel %vm1624_vm4, %v1593_v39, %v3089_v9  ;;  %v957_v36 = vpack.i.b16 %v3148_v57, %v3145_v28 }
 0x144   : > { %v1659_v17 = vsel %vm1657_vm5, %v1626_v33, %v3075_v2  ;;  %v1312_v2 = vrot.slane %v3103_v50, 1 }
 0x145   : > { %1496 = vrot.lane.b32.xlu0 %v3103_v50, %s2447_s11  ;;  %v1562_v18 = vpop.permute.xlu1 %1561 }
 0x147   : > { %v1527_v32 = vpop.permute.xlu0 %1526  ;;  %1494 = vrot.lane.b32.xlu1 %v3083_v21, %s2447_s11 }
 0x148   : > { %v1793_v37 = vsel %vm1789_vm9, %v1760_v38, %v1527_v32  ;;  %v959_v32 = vshrl.u32 %v3148_v57, 16 }
 0x149   : > { %1542 = vrot.lane.b32.xlu0 %v3151_v27, %s2453_s26  ;;  %v1409_v34 = vpop.permute.xlu1 %1408  ;;  %v1826_v31 = vsel %vm1822_vm10, %v1793_v37, %v1562_v18  ;;  %v1597_v18 = vsel %vm1591_vm3, %v2684_v61, %v3131_v44  ;;  %v1315_v37 = vrot.slane %v2863_v62, 1 }
 0x14a   : > { %v1692_v9 = vsel %vm1690_vm6, %v1659_v17, %v1409_v34 }
 0x14b   : > { %v1253_v4 = vpop.permute.xlu0 %1252  ;;  %v1725_v3 = vsel %vm1723_vm7, %v1692_v9, %v1444_v47  ;;  %1540 = vrot.lane.b32.xlu1 %v1185_v26, %s2453_s26  ;;  %v2249_v47 = vcombine.low %v957_v36, %v957_v36  ;;  %v1314_v36 = vsel %vm1278_vm0, %v1312_v2, %v1313_v23 }
 0x14c   : > { %v1758_v5 = vsel %vm1756_vm8, %v1725_v3, %v3085_v30  ;;  %v958_v30 = vshrl.u32 %v3145_v28, 16  ;;  %v1599_v23 = vsel %vm1591_vm3, %v2701_v12, %v1253_v4  ;;  %v1211_v12 = vshrl.u32 %v2876_v7, 16 }
 0x14d   : > { %1266 = vrot.lane.b32.xlu0 %v1185_v26, %s2450_s21  ;;  %v1525_v29 = vpop.permute.xlu1 %1524  ;;  %v1201_v26 = vshll.u32 %v2863_v62, 16  ;;  %v1206_v34 = vshll.u32 %v2249_v47, 16  ;;  %v1632_v61 = vsel %vm1624_vm4, %v1599_v23, %v3101_v24 }
 0x14e   : > { %v1791_v39 = vsel %vm1789_vm9, %v1758_v5, %v1525_v29  ;;  %v960_v5 = vpack.i.b16 %v959_v32, %v958_v30  ;;  %v1316_v29 = vrot.slane %v2249_v47, 1  ;;  %v1213_v30 = vshll.u32 %v2876_v7, 16 }
 0x14f   : > { %v3173_v13 = vpop.permute.xlu0 %1414  ;;  %1575 = vrot.lane.b32.xlu1 %v3119_v35, %s2451_s22  ;;  %v1824_v55 = vsel %vm1822_vm10, %v1791_v39, %v3109_v40  ;;  %v1203_v17 = vrot.slane %v1201_v26, 1  ;;  %v1208_v38 = vrot.slane %v1206_v34, 1  ;;  %v1630_v32 = vsel %vm1624_vm4, %v1597_v18, %v3123_v8 }
 0x150   : > { %2304 = vmatprep.mubr.msk.bf16.mxu0 %vm1882_vm11, %v1824_v55  ;;  %v2250_v55 = vcombine.low %v960_v5, %v960_v5  ;;  %v1663_v44 = vsel %vm1657_vm5, %v1630_v32, %v3095_v54  ;;  %v3220_v47 = vsel %vm1278_vm0, %v1315_v37, %v1316_v29  ;;  %v1215_v8 = vrot.slane %v1213_v30, 1 }
 0x151   : > { %1268 = vrot.lane.b32.xlu0 %v3151_v27, %s2450_s21  ;;  %v1413_v33 = vpop.permute.xlu1 %1412  ;;  %2305 = vmatmul.mubr.msk.bf16.vlgmr.msra.gmra.mrb[0].mxu0 %vm1882_vm11, %v1826_v31  ;;  %v1204_v3 = vor.u32 %v1203_v17, %v1199_v45  ;;  %v1665_v24 = vsel %vm1657_vm5, %v1632_v61, %v3058_v53  ;;  %v689_v29 = vcombine.high %v3145_v28, %v3592_v6 }
 0x152   : > { %v1218_v31 = vshll.u32 %v2250_v55, 16  ;;  %v1696_v45 = vsel %vm1690_vm6, %v1663_v44, %v1413_v33  ;;  %v1216_v5 = vor.u32 %v1215_v8, %v1211_v12  ;;  %v1698_v18 = vsel %vm1690_vm6, %v1665_v24, %v3173_v13 }
 0x153   : > { %v1450_v46 = vpop.permute.xlu0 %1449  ;;  %1577 = vrot.lane.b32.xlu1 %v1314_v36, %s2451_s22  ;;  %v1209_v39 = vsel %vm1053_vm1, %v1204_v3, %v1208_v38  ;;  %v714_v13 = vcombine.high %v3148_v57, %v3592_v6  ;;  %v1319_v32 = vrot.slane %v2250_v55, 1  ;;  %v1225_v12 = vshll.u32 %v2871_v42, 16 }
 0x154   : > { %v1220_v33 = vrot.slane %v1218_v31, 1  ;;  %v1731_v53 = vsel %vm1723_vm7, %v1698_v18, %v1450_v46  ;;  %v964_v44 = vshrl.u32 %v689_v29, 16  ;;  %v771_v18 = vcombine.low %v3023_v63, %v3048_v60 }
 0x155   : > { %1349 = vrot.lane.b32.xlu0 %v1314_v36, %s2448_s16  ;;  %v1448_v9 = vpop.permute.xlu1 %1447  ;;  %v963_v6 = vpack.i.b16 %v714_v13, %v689_v29  ;;  %v1227_v55 = vrot.slane %v1225_v12, 1  ;;  %v1235_v12 = vshrl.u32 %v2971_v15, 16 }
 0x156   : > { %v1729_v17 = vsel %vm1723_vm7, %v1696_v45, %v1448_v9  ;;  %v3251_v30 = vsel %vm1053_vm1, %v1216_v5, %v1220_v33  ;;  %v1223_v45 = vshrl.u32 %v2871_v42, 16  ;;  %v747_v5 = vcombine.low %v2920_v52, %v2964_v11 }
 0x157   : > { %v1485_v40 = vpop.permute.xlu0 %1484  ;;  %1347 = vrot.lane.b32.xlu1 %v3119_v35, %s2448_s16  ;;  %v2251_v61 = vcombine.low %v963_v6, %v963_v6  ;;  %v763_v33 = vcombine.low %v3007_v1, %v3035_v20  ;;  %v778_v20 = vrot.slane %v771_v18, %v2593_v14 }
 0x159   : > { %1384 = vrot.lane.b32.xlu0 %v2863_v62, %s2446_s10  ;;  %v1483_v26 = vpop.permute.xlu1 %1482  ;;  %v1230_v24 = vshll.u32 %v2251_v61, 16  ;;  %v770_v63 = vrot.slane %v763_v33, %v2593_v14 }
 0x15a   : > { %v1762_v54 = vsel %vm1756_vm8, %v1729_v17, %v1483_v26  ;;  %v2401_v17 = vld [vmem:[%s2499_s19 + $0x8] sm:$0x1] }
 0x15b   : > { %v1531_v2 = vpop.permute.xlu0 %1530  ;;  %1382 = vrot.lane.b32.xlu1 %v3103_v50, %s2446_s10 }
 0x15d   : > { %1430 = vrot.lane.b32.xlu0 %v1209_v39, %s2452_s25  ;;  %v1529_v4 = vpop.permute.xlu1 %1528 }
 0x15e   : > { %v1795_v3 = vsel %vm1789_vm9, %v1762_v54, %v1529_v4  ;;  %v965_v4 = vshrl.u32 %v714_v13, 16  ;;  %v715_v54 = vcombine.low %v2401_v17, %v2951_v16  ;;  %v787_v16 = vcombine.low %v2997_v58, %v3027_v0 }
 0x15f   : > { %v3214_v35 = vpop.permute.xlu0 %1254  ;;  %1428 = vrot.lane.b32.xlu1 %v3151_v27, %s2452_s25  ;;  %v1764_v27 = vsel %vm1756_vm8, %v1731_v53, %v1485_v40  ;;  %v754_v0 = vrot.slane %v747_v5, %v2593_v14  ;;  %v1321_v53 = vrot.slane %v2871_v42, 1  ;;  %v1322_v13 = vrot.slane %v2251_v61, 1 }
 0x160   : > { %v1797_v23 = vsel %vm1789_vm9, %v1764_v27, %v1531_v2  ;;  %v1318_v2 = vrot.slane %v2876_v7, 1  ;;  %v966_v52 = vpack.i.b16 %v965_v4, %v964_v44  ;;  %v722_v11 = vrot.slane %v715_v54, %v2593_v14 }
 0x161   : > { %1465 = vrot.lane.b32.xlu0 %v3220_v47, %s2449_s17  ;;  %v1564_v38 = vpop.permute.xlu1 %1563  ;;  %v1601_v6 = vsel %vm1591_vm3, %v2676_v41, %v3214_v35 }
 0x162   : > { %v1828_v37 = vsel %vm1822_vm10, %v1795_v3, %v1564_v38  ;;  %v3274_v31 = vsel %vm1278_vm0, %v1318_v2, %v1319_v32  ;;  %v739_v3 = vcombine.low %v2911_v48, %v2934_v10  ;;  %v723_v38 = vcombine.low %v2928_v56, %v2994_v49 }
 0x163   : > { %v3231_v34 = vpop.permute.xlu0 %1256  ;;  %1463 = vrot.lane.b32.xlu1 %v1314_v36, %s2449_s17  ;;  %2308 = vmatprep.mubr.msk.bf16.mxu0 %vm1882_vm11, %v1828_v37  ;;  %v795_v48 = vcombine.low %v3014_v43, %v3038_v51  ;;  %v1228_v49 = vor.u32 %v1227_v55, %v1223_v45  ;;  %v1232_v37 = vrot.slane %v1230_v24, 1  ;;  %v794_v43 = vrot.slane %v787_v16, %v2593_v14 }
 0x164   : > { %v746_v1 = vrot.slane %v739_v3, %v2593_v14  ;;  %v730_v58 = vrot.slane %v723_v38, %v2593_v14  ;;  %v3326_v45 = vsel %vm1278_vm0, %v1321_v53, %v1322_v13 }
 0x165   : > { %1500 = vrot.lane.b32.xlu0 %v2876_v7, %s2447_s11  ;;  %v1566_v26 = vpop.permute.xlu1 %1565  ;;  %v802_v51 = vrot.slane %v795_v48, %v2593_v14  ;;  %v1233_v29 = vsel %vm1053_vm1, %v1228_v49, %v1232_v37  ;;  %v779_v14 = vcombine.low %v770_v63, %v778_v20 }
 0x166   : > { %v1830_v46 = vsel %vm1822_vm10, %v1797_v23, %v1566_v26  ;;  %v3311_v23 = vcombine.low %v966_v52, %v966_v52  ;;  %v1237_v26 = vshll.u32 %v2971_v15, 16 }
 0x167   : > { %v3243_v9 = vpop.permute.xlu0 %1337  ;;  %1498 = vrot.lane.b32.xlu1 %v2863_v62, %s2447_s11  ;;  %2309 = vmatmul.mubr.msk.bf16.gmra.mrb[4].mxu0 %vm1882_vm11, %v1830_v46  ;;  %v755_v46 = vcombine.low %v746_v1, %v754_v0  ;;  %v803_v2 = vcombine.low %v794_v43, %v802_v51  ;;  %v786_v54 = vrot.slane %v779_v14, %v2598_v22 }
 0x168   : > { %v1239_v55 = vrot.slane %v1237_v26, 1  ;;  %v1242_v41 = vshll.u32 %v3311_v23, 16  ;;  %v1325_v13 = vrot.slane %v3311_v23, 1 }
 0x169   : > { %1546 = vrot.lane.b32.xlu0 %v3251_v30, %s2453_s26  ;;  %v1336_v36 = vpop.permute.xlu1 %1335  ;;  %v762_v24 = vrot.slane %v755_v46, %v2598_v22  ;;  %v916_v43 = vshrl.u32 %v786_v54, 16 }
 0x16a   : > { %v1634_v32 = vsel %vm1624_vm4, %v1601_v6, %v1336_v36  ;;  %v1240_v16 = vor.u32 %v1239_v55, %v1235_v12  ;;  %v1244_v18 = vrot.slane %v1242_v41, 1 }
 0x16b   : > { %v3259_v28 = vpop.permute.xlu0 %1372  ;;  %1544 = vrot.lane.b32.xlu1 %v1209_v39, %s2453_s26  ;;  %v863_v63 = vshrl.u32 %v762_v24, 16 }
 0x16c   : > { %v3365_v52 = vsel %vm1053_vm1, %v1240_v16, %v1244_v18 }
 0x16d   : > { %1270 = vrot.lane.b32.xlu0 %v1209_v39, %s2450_s21  ;;  %v1371_v40 = vpop.permute.xlu1 %1370 }
 0x16e   : > { %v1667_v44 = vsel %vm1657_vm5, %v1634_v32, %v1371_v40  ;;  %v1603_v40 = vsel %vm1591_vm3, %v2878_v25, %v3231_v34 }
 0x16f   : > { %v3263_v57 = vpop.permute.xlu0 %1418  ;;  %1579 = vrot.lane.b32.xlu1 %v3220_v47, %s2451_s22  ;;  %v1636_v3 = vsel %vm1624_vm4, %v1603_v40, %v3243_v9 }
 0x170   : > { %v1669_v33 = vsel %vm1657_vm5, %v1636_v3, %v3259_v28 }
 0x171   : > { %1272 = vrot.lane.b32.xlu0 %v3251_v30, %s2450_s21  ;;  %v1417_v39 = vpop.permute.xlu1 %1416 }
 0x172   : > { %v1700_v35 = vsel %vm1690_vm6, %v1667_v44, %v1417_v39  ;;  %v810_v39 = vrot.slane %v803_v2, %v2598_v22 }
 0x173   : > { %v3271_v8 = vpop.permute.xlu0 %1453  ;;  %1581 = vrot.lane.b32.xlu1 %v3274_v31, %s2451_s22 }
 0x174   : > { %v915_v49 = vpack.i.b16 %v810_v39, %v786_v54 }
 0x175   : > { %1353 = vrot.lane.b32.xlu0 %v3274_v31, %s2448_s16  ;;  %v1452_v56 = vpop.permute.xlu1 %1451 }
 0x176   : > { %v1733_v17 = vsel %vm1723_vm7, %v1700_v35, %v1452_v56 }
 0x177   : > { %v1489_v10 = vpop.permute.xlu0 %1488  ;;  %1351 = vrot.lane.b32.xlu1 %v3220_v47, %s2448_s16  ;;  %v731_v47 = vcombine.low %v722_v11, %v730_v58 }
 0x179   : > { %1388 = vrot.lane.b32.xlu0 %v2871_v42, %s2446_s10  ;;  %v1487_v27 = vpop.permute.xlu1 %1486  ;;  %v738_v36 = vrot.slane %v731_v47, %v2598_v22 }
 0x17a   : > { %v1766_v38 = vsel %vm1756_vm8, %v1733_v17, %v1487_v27  ;;  %v1324_v27 = vrot.slane %v2971_v15, 1 }
 0x17b   : > { %v1535_v60 = vpop.permute.xlu0 %1534  ;;  %1386 = vrot.lane.b32.xlu1 %v2876_v7, %s2446_s10  ;;  %v861_v56 = vpack.i.b16 %v762_v24, %v738_v36  ;;  %v862_v0 = vshrl.u32 %v738_v36, 16 }
 0x17c   : > { %v1326_v32 = vsel %vm1278_vm0, %v1324_v27, %v1325_v13 }
 0x17d   : > { %1434 = vrot.lane.b32.xlu0 %v1233_v29, %s2452_s25  ;;  %v1533_v4 = vpop.permute.xlu1 %1532  ;;  %v3377_v1 = vcombine.low %v861_v56, %v915_v49  ;;  %v864_v12 = vpack.i.b16 %v863_v63, %v862_v0 }
 0x17e   : > { %v1799_v25 = vsel %vm1789_vm9, %v1766_v38, %v1533_v4 }
 0x17f   : > { %v3321_v61 = vpop.permute.xlu0 %1258  ;;  %1432 = vrot.lane.b32.xlu1 %v3251_v30, %s2452_s25  ;;  %v1702_v30 = vsel %vm1690_vm6, %v1669_v33, %v3263_v57  ;;  %v1399_v26 = vshll.u32 %v3377_v1, 16  ;;  %v1397_v14 = vshrl.u32 %v3377_v1, 16  ;;  %v1440_v3 = vrot.slane %v3377_v1, 1  ;;  %v3594_v33 = vld [vmem:[#allocation2_spill] sm:$0xff] }
 0x180   : > { %v1735_v9 = vsel %vm1723_vm7, %v1702_v30, %v3271_v8  ;;  %v3593_v8 = vld [vmem:[#allocation5_spill] sm:$0xff] }
 0x181   : > { %1469 = vrot.lane.b32.xlu0 %v3326_v45, %s2449_s17  ;;  %v1568_v34 = vpop.permute.xlu1 %1567  ;;  %v1768_v28 = vsel %vm1756_vm8, %v1735_v9, %v1489_v10  ;;  %v971_v47 = vshrl.u32 %v3593_v8, 16  ;;  %v1401_v23 = vrot.slane %v1399_v26, 1 }
 0x182   : > { %v1832_v22 = vsel %vm1822_vm10, %v1799_v25, %v1568_v34  ;;  %v1801_v57 = vsel %vm1789_vm9, %v1768_v28, %v1535_v60  ;;  %v917_v60 = vshrl.u32 %v810_v39, 16  ;;  %v1605_v25 = vsel %vm1591_vm3, %v3594_v33, %v3321_v61  ;;  %v3595_v61 = vld [vmem:[#allocation3_spill] sm:$0xff] }
 0x183   : > { %v3345_v5 = vpop.permute.xlu0 %1260  ;;  %1467 = vrot.lane.b32.xlu1 %v3274_v31, %s2449_s17  ;;  %2312 = vmatprep.mubr.msk.bf16.mxu0 %vm1882_vm11, %v1832_v22  ;;  %v969_v31 = vpack.i.b16 %v3593_v8, %v3064_v59  ;;  %v1402_v35 = vor.u32 %v1401_v23, %v1397_v14 }
 0x184   : > { %v918_v44 = vpack.i.b16 %v917_v60, %v916_v43  ;;  %v1607_v49 = vsel %vm1591_vm3, %v3595_v61, %v3345_v5 }
 0x185   : > { %1504 = vrot.lane.b32.xlu0 %v2971_v15, %s2447_s11  ;;  %v1570_v37 = vpop.permute.xlu1 %1569  ;;  %v2254_v20 = vcombine.low %v969_v31, %v969_v31 }
 0x186   : > { %v1834_v11 = vsel %vm1822_vm10, %v1801_v57, %v1570_v37  ;;  %v2255_v36 = vcombine.low %v864_v12, %v918_v44 }
 0x187   : > { %v3361_v48 = vpop.permute.xlu0 %1341  ;;  %1502 = vrot.lane.b32.xlu1 %v2871_v42, %s2447_s11  ;;  %2313 = vmatmul.mubr.msk.bf16.gmra.mrb[8].mxu0 %vm1882_vm11, %v1834_v11  ;;  %v1404_v46 = vshll.u32 %v2254_v20, 16  ;;  %v1441_v17 = vrot.slane %v2254_v20, 1 }
 0x188   : > { %v1515_v38 = vshll.u32 %v2255_v36, 16  ;;  %v1513_v9 = vshrl.u32 %v2255_v36, 16  ;;  %v1640_v37 = vsel %vm1624_vm4, %v1607_v49, %v3361_v48  ;;  %v1556_v13 = vrot.slane %v2255_v36, 1 }
 0x189   : > { %1550 = vrot.lane.b32.xlu0 %v3365_v52, %s2453_s26  ;;  %v1340_v58 = vpop.permute.xlu1 %1339  ;;  %v1406_v41 = vrot.slane %v1404_v46, 1  ;;  %v1442_v22 = vsel %vm1278_vm0, %v1440_v3, %v1441_v17 }
 0x18a   : > { %v1517_v28 = vrot.slane %v1515_v38, 1 }
 0x18b   : > { %v3375_v10 = vpop.permute.xlu0 %1376  ;;  %1548 = vrot.lane.b32.xlu1 %v1233_v29, %s2453_s26  ;;  %v1407_v39 = vsel %vm1053_vm1, %v1402_v35, %v1406_v41 }
 0x18c   : > { %v1673_v31 = vsel %vm1657_vm5, %v1640_v37, %v3375_v10  ;;  %v1518_v63 = vor.u32 %v1517_v28, %v1513_v9 }
 0x18d   : > { %1274 = vrot.lane.b32.xlu0 %v1233_v29, %s2450_s21  ;;  %v1375_v53 = vpop.permute.xlu1 %1374  ;;  %v970_v29 = vshrl.u32 %v3064_v59, 16 }
 0x18f   : > { %v1423_v51 = vpop.permute.xlu0 %1422  ;;  %1583 = vrot.lane.b32.xlu1 %v3326_v45, %s2451_s22  ;;  %v972_v4 = vpack.i.b16 %v971_v47, %v970_v29 }
 0x190   : > { %v1706_v5 = vsel %vm1690_vm6, %v1673_v31, %v1423_v51 }
 0x191   : > { %1276 = vrot.lane.b32.xlu0 %v3365_v52, %s2450_s21  ;;  %v1421_v2 = vpop.permute.xlu1 %1420  ;;  %v2256_v24 = vcombine.low %v972_v4, %v972_v4  ;;  %v3596_v4 = vld [vmem:[#allocation4_spill] sm:$0xff] }
 0x193   : > { %v1458_v6 = vpop.permute.xlu0 %1457  ;;  %1585 = vrot.lane.b32.xlu1 %v1326_v32, %s2451_s22  ;;  %v1520_v34 = vshll.u32 %v2256_v24, 16  ;;  %v1557_v51 = vrot.slane %v2256_v24, 1 }
 0x195   : > { %1357 = vrot.lane.b32.xlu0 %v1326_v32, %s2448_s16  ;;  %v1456_v59 = vpop.permute.xlu1 %1455  ;;  %v1522_v43 = vrot.slane %v1520_v34, 1  ;;  %v1558_v46 = vsel %vm1278_vm0, %v1556_v13, %v1557_v51 }
 0x197   : > { %v1493_v55 = vpop.permute.xlu0 %1492  ;;  %1355 = vrot.lane.b32.xlu1 %v3326_v45, %s2448_s16  ;;  %v1638_v45 = vsel %vm1624_vm4, %v1605_v25, %v1340_v58  ;;  %v1523_v27 = vsel %vm1053_vm1, %v1518_v63, %v1522_v43 }
 0x198   : > { %v1671_v18 = vsel %vm1657_vm5, %v1638_v45, %v1375_v53 }
 0x199   : > { %1392 = vrot.lane.b32.xlu0 %v3377_v1, %s2446_s10  ;;  %v1491_v54 = vpop.permute.xlu1 %1490  ;;  %v1704_v56 = vsel %vm1690_vm6, %v1671_v18, %v1421_v2 }
 0x19a   : > { %v1737_v57 = vsel %vm1723_vm7, %v1704_v56, %v1456_v59 }
 0x19b   : > { %v1539_v40 = vpop.permute.xlu0 %1538  ;;  %1390 = vrot.lane.b32.xlu1 %v2971_v15, %s2446_s10  ;;  %v1770_v11 = vsel %vm1756_vm8, %v1737_v57, %v1491_v54 }
 0x19d   : > { %1438 = vrot.lane.b32.xlu0 %v1407_v39, %s2452_s25  ;;  %v1537_v30 = vpop.permute.xlu1 %1536 }
 0x19e   : > { %v1803_v58 = vsel %vm1789_vm9, %v1770_v11, %v1537_v30 }
 0x19f   : > { %v1263_v16 = vpop.permute.xlu0 %1262  ;;  %1436 = vrot.lane.b32.xlu1 %v3365_v52, %s2452_s25  ;;  %v1739_v52 = vsel %vm1723_vm7, %v1706_v5, %v1458_v6 }
 0x1a0   : > { %v1772_v48 = vsel %vm1756_vm8, %v1739_v52, %v1493_v55  ;;  %v1609_v55 = vsel %vm1591_vm3, %v3596_v4, %v1263_v16 }
 0x1a1   : > { %1473 = vrot.lane.b32.xlu0 %v1442_v22, %s2449_s17  ;;  %v1572_v0 = vpop.permute.xlu1 %1571  ;;  %v1805_v60 = vsel %vm1789_vm9, %v1772_v48, %v1539_v40 }
 0x1a2   : > { %v1836_v20 = vsel %vm1822_vm10, %v1803_v58, %v1572_v0 }
 0x1a3   : > { %v1265_v8 = vpop.permute.xlu0 %1264  ;;  %1471 = vrot.lane.b32.xlu1 %v1326_v32, %s2449_s17  ;;  %2316 = vmatprep.mubr.msk.bf16.mxu0 %vm1882_vm11, %v1836_v20 }
 0x1a4   : > { %v1611_v40 = vsel %vm1591_vm3, %v3031_v19, %v1265_v8 }
 0x1a5   : > { %1508 = vrot.lane.b32.xlu0 %v2255_v36, %s2447_s11  ;;  %v1574_v53 = vpop.permute.xlu1 %1573 }
 0x1a6   : > { %v1838_v26 = vsel %vm1822_vm10, %v1805_v60, %v1574_v53 }
 0x1a7   : > { %v1346_v10 = vpop.permute.xlu0 %1345  ;;  %1506 = vrot.lane.b32.xlu1 %v3377_v1, %s2447_s11  ;;  %2317 = vmatmul.mubr.msk.bf16.gmra.mrb[12].mxu0 %vm1882_vm11, %v1838_v26 }
 0x1a8   : > { %v1644_v54 = vsel %vm1624_vm4, %v1611_v40, %v1346_v10 }
 0x1a9   : > { %1554 = vrot.lane.b32.xlu0 %v1523_v27, %s2453_s26  ;;  %v1344_v47 = vpop.permute.xlu1 %1343 }
 0x1aa   : > { %v1642_v41 = vsel %vm1624_vm4, %v1609_v55, %v1344_v47 }
 0x1ab   : > { %v1381_v29 = vpop.permute.xlu0 %1380  ;;  %1552 = vrot.lane.b32.xlu1 %v1407_v39, %s2453_s26 }
 0x1ac   : > { %v1677_v38 = vsel %vm1657_vm5, %v1644_v54, %v1381_v29 }
 0x1ad   : > { %1589 = vrot.lane.b32.xlu0 %v1558_v46, %s2451_s22  ;;  %v1379_v14 = vpop.permute.xlu1 %1378 }
 0x1ae   : > { %v1675_v35 = vsel %vm1657_vm5, %v1642_v41, %v1379_v14 }
 0x1af   : > { %v1427_v6 = vpop.permute.xlu0 %1426  ;;  %1587 = vrot.lane.b32.xlu1 %v1442_v22, %s2451_s22 }
 0x1b0   : > { %v1710_v34 = vsel %vm1690_vm6, %v1677_v38, %v1427_v6 }
 0x1b1   : > { %v1425_v32 = vpop.permute.xlu1 %1424 }
 0x1b2   : > { %v1708_v24 = vsel %vm1690_vm6, %v1675_v35, %v1425_v32 }
 0x1b3   : > { %v1462_v2 = vpop.permute.xlu0 %1461 }
 0x1b4   : > { %v1743_v16 = vsel %vm1723_vm7, %v1710_v34, %v1462_v2 }
 0x1b5   : > { %v1460_v12 = vpop.permute.xlu1 %1459 }
 0x1b6   : > { %v1741_v17 = vsel %vm1723_vm7, %v1708_v24, %v1460_v12 }
 0x1b7   : > { %v1497_v23 = vpop.permute.xlu0 %1496 }
 0x1b8   : > { %v1776_v19 = vsel %vm1756_vm8, %v1743_v16, %v1497_v23 }
 0x1b9   : > { %v1495_v1 = vpop.permute.xlu1 %1494 }
 0x1ba   : > { %v1774_v39 = vsel %vm1756_vm8, %v1741_v17, %v1495_v1 }
 0x1bb   : > { %v1543_v44 = vpop.permute.xlu0 %1542 }
 0x1bc   : > { %v1809_v30 = vsel %vm1789_vm9, %v1776_v19, %v1543_v44 }
 0x1bd   : > { %v1541_v36 = vpop.permute.xlu1 %1540 }
 0x1be   : > { %v1807_v33 = vsel %vm1789_vm9, %v1774_v39, %v1541_v36 }
 0x1bf   : > { %v1267_v59 = vpop.permute.xlu0 %1266 }
 0x1c0   : > { %v1613_v0 = vsel %vm1591_vm3, %v3083_v21, %v1267_v59 }
 0x1c1   : > { %v1576_v25 = vpop.permute.xlu1 %1575 }
 0x1c2   : > { %v1840_v45 = vsel %vm1822_vm10, %v1807_v33, %v1576_v25 }
 0x1c3   : > { %v1269_v3 = vpop.permute.xlu0 %1268  ;;  %2320 = vmatprep.mubr.msk.bf16.mxu1 %vm1882_vm11, %v1840_v45 }
 0x1c4   : > { %v1615_v48 = vsel %vm1591_vm3, %v3103_v50, %v1269_v3 }
 0x1c5   : > { %v1578_v22 = vpop.permute.xlu1 %1577 }
 0x1c6   : > { %v1842_v9 = vsel %vm1822_vm10, %v1809_v30, %v1578_v22 }
 0x1c7   : > { %v1350_v18 = vpop.permute.xlu0 %1349  ;;  %2321 = vmatmul.mubr.msk.bf16.vlgmr.msra.gmra.mrb[0].mxu1 %vm1882_vm11, %v1842_v9 }
 0x1c8   : > { %v1648_v60 = vsel %vm1624_vm4, %v1615_v48, %v1350_v18 }
 0x1c9   : > { %v1348_v56 = vpop.permute.xlu1 %1347 }
 0x1ca   : > { %v1646_v63 = vsel %vm1624_vm4, %v1613_v0, %v1348_v56 }
 0x1cb   : > { %v1385_v28 = vpop.permute.xlu0 %1384 }
 0x1cc   : > { %v1681_v21 = vsel %vm1657_vm5, %v1648_v60, %v1385_v28 }
 0x1cd   : > { %v1383_v49 = vpop.permute.xlu1 %1382 }
 0x1ce   : > { %v1679_v5 = vsel %vm1657_vm5, %v1646_v63, %v1383_v49 }
 0x1cf   : > { %v1431_v61 = vpop.permute.xlu0 %1430 }
 0x1d0   : > { %v1714_v26 = vsel %vm1690_vm6, %v1681_v21, %v1431_v61 }
 0x1d1   : > { %v1429_v37 = vpop.permute.xlu1 %1428 }
 0x1d2   : > { %v1712_v52 = vsel %vm1690_vm6, %v1679_v5, %v1429_v37 }
 0x1d3   : > { %v1466_v57 = vpop.permute.xlu0 %1465 }
 0x1d4   : > { %v1747_v47 = vsel %vm1723_vm7, %v1714_v26, %v1466_v57 }
 0x1d5   : > { %v1464_v8 = vpop.permute.xlu1 %1463 }
 0x1d6   : > { %v1745_v10 = vsel %vm1723_vm7, %v1712_v52, %v1464_v8 }
 0x1d7   : > { %v1501_v11 = vpop.permute.xlu0 %1500 }
 0x1d8   : > { %v1780_v50 = vsel %vm1756_vm8, %v1747_v47, %v1501_v11 }
 0x1d9   : > { %v1499_v58 = vpop.permute.xlu1 %1498 }
 0x1da   : > { %v1778_v53 = vsel %vm1756_vm8, %v1745_v10, %v1499_v58 }
 0x1db   : > { %v1547_v31 = vpop.permute.xlu0 %1546 }
 0x1dc   : > { %v1813_v6 = vsel %vm1789_vm9, %v1780_v50, %v1547_v31 }
 0x1dd   : > { %v1545_v20 = vpop.permute.xlu1 %1544 }
 0x1de   : > { %v1811_v13 = vsel %vm1789_vm9, %v1778_v53, %v1545_v20 }
 0x1df   : > { %v1271_v43 = vpop.permute.xlu0 %1270 }
 0x1e0   : > { %v1617_v36 = vsel %vm1591_vm3, %v2863_v62, %v1271_v43 }
 0x1e1   : > { %v1580_v51 = vpop.permute.xlu1 %1579 }
 0x1e2   : > { %v1844_v29 = vsel %vm1822_vm10, %v1811_v13, %v1580_v51 }
 0x1e3   : > { %v1273_v27 = vpop.permute.xlu0 %1272  ;;  %2324 = vmatprep.mubr.msk.bf16.mxu1 %vm1882_vm11, %v1844_v29 }
 0x1e4   : > { %v1619_v3 = vsel %vm1591_vm3, %v2876_v7, %v1273_v27 }
 0x1e5   : > { %v1582_v14 = vpop.permute.xlu1 %1581 }
 0x1e6   : > { %v1846_v2 = vsel %vm1822_vm10, %v1813_v6, %v1582_v14  ;;  %v3523_v6 = vld [vmem:[%s3580_s2] ss:$0 sm:$0xff] }
 0x1e7   : > { %v1354_v46 = vpop.permute.xlu0 %1353  ;;  %2325 = vmatmul.mubr.msk.bf16.gmra.mrb[4].mxu1 %vm1882_vm11, %v1846_v2 }
 0x1e8   : > { %v1652_v33 = vsel %vm1624_vm4, %v1619_v3, %v1354_v46 }
 0x1e9   : > { %v1352_v23 = vpop.permute.xlu1 %1351 }
 0x1ea   : > { %v1650_v24 = vsel %vm1624_vm4, %v1617_v36, %v1352_v23 }
 0x1eb   : > { %v1389_v32 = vpop.permute.xlu0 %1388 }
 0x1ec   : > { %v1685_v62 = vsel %vm1657_vm5, %v1652_v33, %v1389_v32 }
 0x1ed   : > { %v1387_v44 = vpop.permute.xlu1 %1386 }
 0x1ee   : > { %v1683_v17 = vsel %vm1657_vm5, %v1650_v24, %v1387_v44 }
 0x1ef   : > { %v1435_v12 = vpop.permute.xlu0 %1434 }
 0x1f0   : > { %v1718_v19 = vsel %vm1690_vm6, %v1685_v62, %v1435_v12 }
 0x1f1   : > { %v1433_v4 = vpop.permute.xlu1 %1432 }
 0x1f2   : > { %v1716_v39 = vsel %vm1690_vm6, %v1683_v17, %v1433_v4 }
 0x1f3   : > { %v1470_v1 = vpop.permute.xlu0 %1469 }
 0x1f4   : > { %v1751_v30 = vsel %vm1723_vm7, %v1718_v19, %v1470_v1 }
 0x1f5   : > { %v1468_v41 = vpop.permute.xlu1 %1467 }
 0x1f6   : > { %v1749_v38 = vsel %vm1723_vm7, %v1716_v39, %v1468_v41 }
 0x1f7   : > { %v1505_v55 = vpop.permute.xlu0 %1504 }
 0x1f8   : > { %v1784_v7 = vsel %vm1756_vm8, %v1751_v30, %v1505_v55 }
 0x1f9   : > { %v1503_v35 = vpop.permute.xlu1 %1502 }
 0x1fa   : > { %v1782_v25 = vsel %vm1756_vm8, %v1749_v38, %v1503_v35 }
 0x1fb   : > { %v1551_v59 = vpop.permute.xlu0 %1550 }
 0x1fc   : > { %v1817_v9 = vsel %vm1789_vm9, %v1784_v7, %v1551_v59 }
 0x1fd   : > { %v1549_v54 = vpop.permute.xlu1 %1548 }
 0x1fe   : > { %v1815_v45 = vsel %vm1789_vm9, %v1782_v25, %v1549_v54 }
 0x1ff   : > { %v1275_v40 = vpop.permute.xlu0 %1274 }
 0x200   : > { %v1621_v43 = vsel %vm1591_vm3, %v2871_v42, %v1275_v40 }
 0x201   : > { %v1584_v16 = vpop.permute.xlu1 %1583 }
 0x202   : > { %v1848_v18 = vsel %vm1822_vm10, %v1815_v45, %v1584_v16 }
 0x203   : > { %v1277_v34 = vpop.permute.xlu0 %1276  ;;  %2328 = vmatprep.mubr.msk.bf16.mxu1 %vm1882_vm11, %v1848_v18 }
 0x204   : > { %v1623_v5 = vsel %vm1591_vm3, %v2971_v15, %v1277_v34 }
 0x205   : > { %v1586_v28 = vpop.permute.xlu1 %1585 }
 0x206   : > { %v1850_v56 = vsel %vm1822_vm10, %v1817_v9, %v1586_v28 }
 0x207   : > { %v1358_v22 = vpop.permute.xlu0 %1357  ;;  %2329 = vmatmul.mubr.msk.bf16.gmra.mrb[8].mxu1 %vm1882_vm11, %v1850_v56 }
 0x208   : > { %v1656_v52 = vsel %vm1624_vm4, %v1623_v5, %v1358_v22 }
 0x209   : > { %v1356_v49 = vpop.permute.xlu1 %1355 }
 0x20a   : > { %v1654_v20 = vsel %vm1624_vm4, %v1621_v43, %v1356_v49 }
 0x20b   : > { %v1393_v61 = vpop.permute.xlu0 %1392 }
 0x20c   : > { %v1689_v60 = vsel %vm1657_vm5, %v1656_v52, %v1393_v61 }
 0x20d   : > { %v1391_v37 = vpop.permute.xlu1 %1390 }
 0x20e   : > { %v1687_v48 = vsel %vm1657_vm5, %v1654_v20, %v1391_v37 }
 0x20f   : > { %v1439_v57 = vpop.permute.xlu0 %1438 }
 0x210   : > { %v1722_v27 = vsel %vm1690_vm6, %v1689_v60, %v1439_v57 }
 0x211   : > { %v1437_v8 = vpop.permute.xlu1 %1436 }
 0x212   : > { %v1720_v53 = vsel %vm1690_vm6, %v1687_v48, %v1437_v8 }
 0x213   : > { %v1474_v11 = vpop.permute.xlu0 %1473 }
 0x214   : > { %v1755_v42 = vsel %vm1723_vm7, %v1722_v27, %v1474_v11 }
 0x215   : > { %v1472_v58 = vpop.permute.xlu1 %1471 }
 0x216   : > { %v1753_v21 = vsel %vm1723_vm7, %v1720_v53, %v1472_v58 }
 0x217   : > { %v1509_v31 = vpop.permute.xlu0 %1508 }
 0x218   : > { %v1788_v51 = vsel %vm1756_vm8, %v1755_v42, %v1509_v31 }
 0x219   : > { %v1507_v0 = vpop.permute.xlu1 %1506 }
 0x21a   : > { %v1786_v13 = vsel %vm1756_vm8, %v1753_v21, %v1507_v0 }
 0x21b   : > { %v1555_v63 = vpop.permute.xlu0 %1554 }
 0x21c   : > { %v1821_v47 = vsel %vm1789_vm9, %v1788_v51, %v1555_v63 }
 0x21d   : > { %v1553_v10 = vpop.permute.xlu1 %1552 }
 0x21e   : > { %v1819_v26 = vsel %vm1789_vm9, %v1786_v13, %v1553_v10  ;;  %v2454_v13 = vmov 0.0  }
 0x21f   : > { %v1590_v15 = vpop.permute.xlu0 %1589  ;;  %184 = vst [vmem:[%s3543_s5] sm:$0x1] %v2454_v13 }
 0x220   : > { %v1854_v46 = vsel %vm1822_vm10, %v1821_v47, %v1590_v15 }
 0x221   : > { %v1588_v29 = vpop.permute.xlu1 %1587 }
 0x222   : > { %v1852_v50 = vsel %vm1822_vm10, %v1819_v26, %v1588_v29 }
 0x223   : > { %2332 = vmatprep.mubr.msk.bf16.mxu1 %vm1882_vm11, %v1852_v50 }
 0x224   : > { %v2306_v14 = vpop.f32.mrb[0].mxu0  ;;  %2333 = vmatmul.mubr.msk.bf16.gmra.mrb[12].mxu1 %vm1882_vm11, %v1854_v46 }
 0x225   : > { %v1953_v2 = vpop.f32.mrb[1].mxu0  ;;  %v1962_v44 = vadd.f32 %v2306_v14, %v3523_v6 }
 0x226   : > { %v1954_v32 = vadd.f32 %v3523_v6, %v1953_v2  ;;  %v2307_v23 = vpop.f32.mrb[2].mxu0 }
 0x227   : > { %v1956_v12 = vpop.f32.mrb[3].mxu0  ;;  %v1965_v55 = vadd.f32 %v2307_v23, %v3523_v6  ;;  %v2082_v59 = vmax.f32 %v1962_v44, 0.0 }
 0x228   : > { %v1957_v1 = vadd.f32 %v3523_v6, %v1956_v12  ;;  %v2080_v4 = vmax.f32 %v1954_v32, 0.0 }
 0x229   : > { %v2083_v36 = vmax.f32 %v1965_v55, 0.0 }
 0x22a   : > { %v2081_v41 = vmax.f32 %v1957_v1, 0.0 }
 0x22c   : > { %v2113_v35 = vadd.f32 %v2081_v41, %v2080_v4 }
 0x22e   : > { %v2114_v24 = vadd.f32 %v2113_v35, %v2082_v59 }
 0x230   : > { %v2115_v40 = vadd.f32 %v2114_v24, %v2083_v36 }
 0x23a   : > { %v2310_v17 = vpop.f32.mrb[4].mxu0 }
 0x23b   : > { %v1969_v54 = vpop.f32.mrb[5].mxu0  ;;  %v1978_v33 = vadd.f32 %v2310_v17, %v3523_v6 }
 0x23c   : > { %v1970_v39 = vadd.f32 %v3523_v6, %v1969_v54  ;;  %v2311_v3 = vpop.f32.mrb[6].mxu0 }
 0x23d   : > { %v1972_v38 = vpop.f32.mrb[7].mxu0  ;;  %v1981_v45 = vadd.f32 %v2311_v3, %v3523_v6  ;;  %v2086_v19 = vmax.f32 %v1978_v33, 0.0 }
 0x23e   : > { %v2084_v25 = vmax.f32 %v1970_v39, 0.0  ;;  %v1973_v34 = vadd.f32 %v3523_v6, %v1972_v38 }
 0x23f   : > { %v2087_v30 = vmax.f32 %v1981_v45, 0.0 }
 0x240   : > { %v2116_v62 = vadd.f32 %v2115_v40, %v2084_v25  ;;  %v2085_v16 = vmax.f32 %v1973_v34, 0.0 }
 0x242   : > { %v2117_v18 = vadd.f32 %v2116_v62, %v2085_v16 }
 0x244   : > { %v2118_v7 = vadd.f32 %v2117_v18, %v2086_v19 }
 0x246   : > { %v2119_v22 = vadd.f32 %v2118_v7, %v2087_v30 }
 0x25a   : > { %v2314_v9 = vpop.f32.mrb[8].mxu0 }
 0x25b   : > { %v1985_v28 = vpop.f32.mrb[9].mxu0  ;;  %v1994_v57 = vadd.f32 %v2314_v9, %v3523_v6 }
 0x25c   : > { %v1986_v56 = vadd.f32 %v3523_v6, %v1985_v28  ;;  %v2315_v61 = vpop.f32.mrb[10].mxu0 }
 0x25d   : > { %v1988_v49 = vpop.f32.mrb[11].mxu0  ;;  %v1997_v31 = vadd.f32 %v2315_v61, %v3523_v6  ;;  %v2090_v0 = vmax.f32 %v1994_v57, 0.0 }
 0x25e   : > { %v2088_v37 = vmax.f32 %v1986_v56, 0.0  ;;  %v1989_v11 = vadd.f32 %v3523_v6, %v1988_v49 }
 0x25f   : > { %v2091_v43 = vmax.f32 %v1997_v31, 0.0 }
 0x260   : > { %v2120_v8 = vadd.f32 %v2119_v22, %v2088_v37  ;;  %v2089_v58 = vmax.f32 %v1989_v11, 0.0 }
 0x262   : > { %v2121_v63 = vadd.f32 %v2120_v8, %v2089_v58 }
 0x264   : > { %v2122_v5 = vadd.f32 %v2121_v63, %v2090_v0 }
 0x266   : > { %v2123_v20 = vadd.f32 %v2122_v5, %v2091_v43 }
 0x27a   : > { %v2318_v52 = vpop.f32.mrb[12].mxu0 }
 0x27b   : > { %v2001_v48 = vpop.f32.mrb[13].mxu0  ;;  %v2010_v27 = vadd.f32 %v2318_v52, %v3523_v6 }
 0x27c   : > { %v2002_v10 = vadd.f32 %v3523_v6, %v2001_v48  ;;  %v2319_v60 = vpop.f32.mrb[14].mxu0 }
 0x27d   : > { %v2004_v53 = vpop.f32.mrb[15].mxu0  ;;  %v2013_v51 = vadd.f32 %v2319_v60, %v3523_v6  ;;  %v2094_v29 = vmax.f32 %v2010_v27, 0.0 }
 0x27e   : > { %v2092_v21 = vmax.f32 %v2002_v10, 0.0  ;;  %v2005_v42 = vadd.f32 %v3523_v6, %v2004_v53 }
 0x27f   : > { %v2095_v50 = vmax.f32 %v2013_v51, 0.0 }
 0x280   : > { %v2124_v15 = vadd.f32 %v2123_v20, %v2092_v21  ;;  %v2093_v26 = vmax.f32 %v2005_v42, 0.0 }
 0x282   : > { %v2125_v47 = vadd.f32 %v2124_v15, %v2093_v26 }
 0x284   : > { %v2126_v46 = vadd.f32 %v2125_v47, %v2094_v29 }
 0x286   : > { %v2127_v14 = vadd.f32 %v2126_v46, %v2095_v50 }
 0x29a   : > { %v2322_v2 = vpop.f32.mrb[0].mxu1 }
 0x29b   : > { %v2017_v32 = vpop.f32.mrb[1].mxu1  ;;  %v2026_v1 = vadd.f32 %v2322_v2, %v3523_v6 }
 0x29c   : > { %v2018_v23 = vadd.f32 %v3523_v6, %v2017_v32  ;;  %v2323_v12 = vpop.f32.mrb[2].mxu1 }
 0x29d   : > { %v2020_v44 = vpop.f32.mrb[3].mxu1  ;;  %v2029_v59 = vadd.f32 %v2323_v12, %v3523_v6  ;;  %v2098_v36 = vmax.f32 %v2026_v1, 0.0 }
 0x29e   : > { %v2096_v4 = vmax.f32 %v2018_v23, 0.0  ;;  %v2021_v55 = vadd.f32 %v3523_v6, %v2020_v44 }
 0x29f   : > { %v2099_v40 = vmax.f32 %v2029_v59, 0.0 }
 0x2a0   : > { %v2128_v41 = vadd.f32 %v2127_v14, %v2096_v4  ;;  %v2097_v35 = vmax.f32 %v2021_v55, 0.0  ;;  %v2112_v4 = vld [vmem:[%s3543_s5] sm:$0x1] }
 0x2a2   : > { %v2129_v24 = vadd.f32 %v2128_v41, %v2097_v35 }
 0x2a4   : > { %v2130_v17 = vadd.f32 %v2129_v24, %v2098_v36 }
 0x2a6   : > { %v2131_v54 = vadd.f32 %v2130_v17, %v2099_v40 }
 0x2ba   : > { %v2326_v39 = vpop.f32.mrb[4].mxu1 }
 0x2bb   : > { %v2033_v3 = vpop.f32.mrb[5].mxu1  ;;  %v2042_v34 = vadd.f32 %v2326_v39, %v3523_v6 }
 0x2bc   : > { %v2034_v38 = vadd.f32 %v3523_v6, %v2033_v3  ;;  %v2327_v33 = vpop.f32.mrb[6].mxu1 }
 0x2bd   : > { %v2036_v25 = vpop.f32.mrb[7].mxu1  ;;  %v2045_v19 = vadd.f32 %v2327_v33, %v3523_v6  ;;  %v2102_v30 = vmax.f32 %v2042_v34, 0.0 }
 0x2be   : > { %v2100_v62 = vmax.f32 %v2034_v38, 0.0  ;;  %v2037_v45 = vadd.f32 %v3523_v6, %v2036_v25 }
 0x2bf   : > { %v2103_v22 = vmax.f32 %v2045_v19, 0.0 }
 0x2c0   : > { %v2132_v16 = vadd.f32 %v2131_v54, %v2100_v62  ;;  %v2101_v18 = vmax.f32 %v2037_v45, 0.0 }
 0x2c2   : > { %v2133_v7 = vadd.f32 %v2132_v16, %v2101_v18 }
 0x2c4   : > { %v2134_v9 = vadd.f32 %v2133_v7, %v2102_v30 }
 0x2c6   : > { %v2135_v28 = vadd.f32 %v2134_v9, %v2103_v22 }
 0x2da   : > { %v2330_v56 = vpop.f32.mrb[8].mxu1 }
 0x2db   : > { %v2049_v61 = vpop.f32.mrb[9].mxu1  ;;  %v2058_v11 = vadd.f32 %v2330_v56, %v3523_v6 }
 0x2dc   : > { %v2050_v49 = vadd.f32 %v3523_v6, %v2049_v61  ;;  %v2331_v57 = vpop.f32.mrb[10].mxu1 }
 0x2dd   : > { %v2052_v37 = vpop.f32.mrb[11].mxu1  ;;  %v2061_v0 = vadd.f32 %v2331_v57, %v3523_v6  ;;  %v2106_v43 = vmax.f32 %v2058_v11, 0.0 }
 0x2de   : > { %v2104_v8 = vmax.f32 %v2050_v49, 0.0  ;;  %v2053_v31 = vadd.f32 %v3523_v6, %v2052_v37 }
 0x2df   : > { %v2107_v20 = vmax.f32 %v2061_v0, 0.0 }
 0x2e0   : > { %v2136_v58 = vadd.f32 %v2135_v28, %v2104_v8  ;;  %v2105_v63 = vmax.f32 %v2053_v31, 0.0 }
 0x2e2   : > { %v2137_v5 = vadd.f32 %v2136_v58, %v2105_v63 }
 0x2e4   : > { %v2138_v52 = vadd.f32 %v2137_v5, %v2106_v43 }
 0x2e6   : > { %v2139_v48 = vadd.f32 %v2138_v52, %v2107_v20 }
 0x2f7   : > { %v2334_v10 = vpop.f32.mrb[12].mxu1 }
 0x2f8   : > { %v2065_v60 = vpop.f32.mrb[13].mxu1  ;;  %v2074_v42 = vadd.f32 %v2334_v10, %v3523_v6 }
 0x2f9   : > { %v2066_v53 = vadd.f32 %v3523_v6, %v2065_v60  ;;  %v2335_v27 = vpop.f32.mrb[14].mxu1 }
 0x2fa   : > { %v2068_v21 = vpop.f32.mrb[15].mxu1  ;;  %v2077_v26 = vadd.f32 %v2335_v27, %v3523_v6  ;;  %v2110_v47 = vmax.f32 %v2074_v42, 0.0 }
 0x2fb   : > { %v2108_v13 = vmax.f32 %v2066_v53, 0.0  ;;  %v2069_v15 = vadd.f32 %v3523_v6, %v2068_v21 }
 0x2fc   : > { %v2111_v46 = vmax.f32 %v2077_v26, 0.0 }
 0x2fd   : > { %v2140_v51 = vadd.f32 %v2139_v48, %v2108_v13  ;;  %v2109_v29 = vmax.f32 %v2069_v15, 0.0 }
 0x2ff   : > { %v2141_v50 = vadd.f32 %v2140_v51, %v2109_v29 }
 0x301   : > { %v2142_v14 = vadd.f32 %v2141_v50, %v2110_v47 }
 0x303   : > { %v2143_v2 = vadd.f32 %v2142_v14, %v2111_v46 }
 0x305   : > { %v2144_v32 = vrot.slane %v2143_v2, 4 }
 0x307   : > { %v2145_v23 = vadd.f32 %v2144_v32, %v2143_v2 }
 0x309   : > { %v2146_v12 = vrot.slane %v2145_v23, 2 }
 0x30b   : > { %v2147_v44 = vadd.f32 %v2146_v12, %v2145_v23 }
 0x30d   : > { %v2148_v1 = vrot.slane %v2147_v44, 1 }
 0x30f   : > { %v2149_v55 = vadd.f32 %v2148_v1, %v2147_v44 }
 0x311   : > { %v2150_v41 = vadd.f32 %v2149_v55, %v2112_v4 }
 0x313   : > { %2151 = vst [vmem:[%s3543_s5] sm:$0x1] %v2150_v41 }
 0x31a   : > { %v2155_v59 = vld [vmem:[%s3543_s5] sm:$0x1] }
 0x31b   : > { %v2156_v35 = vmul.f32 0.00390625, %v2155_v59 }
 0x31d   : > { %2157 = vst [vmem:[%s3543_s5] sm:$0x1] %v2156_v35 }
 0x31e PF: > { %s13_s14 = sadd.s32 1, %s2424_s14   ;;  %s3597_s12 = smov %s2420_s13 }
 0x31f   : > { %p10_p5 = scmp.ge.s32.totalorder %s13_s14, 6   ;;  %s3598_s13 = smov %s3600_s15 }
 0x321   :  { %12 = sbr.rel (!%p10_p5) target bundleno = 2 (0x2), region = 71 }

</bundles_post_ra>
